<compile_context>
chip_gen: v7x
topology: tpu7x:2x2x1
jax: 0.10.0
libtpu: 0.0.40
codegen_flags: <defaults>
</compile_context>

<pallas_src>
import jax
import jax.numpy as jnp
from jax.experimental import pallas as pl
from jax.experimental.pallas import tpu as pltpu


# --------------------------------------------------------------------------
# Kernel
# --------------------------------------------------------------------------
def mdrnn_kernel(x_ref, wih_ref, whh_ref, b_ref, wg_ref, bg_ref,
                 out_ref, h_ref, c_ref, hbuf_ref, xw_ref):
    """One (batch-block, time-chunk) grid point.

    x_ref   : (T, Bb, IN)        f32 inputs for this chunk / batch block
    wih_ref : (IN, 4*Hp)         input->gates weights  (gate order i|f|o|g)
    whh_ref : (Hp, 4*Hp)         hidden->gates weights (gate order i|f|o|g)
    b_ref   : (1, 4*Hp)          folded bias (b_ih + b_hh), f32
    wg_ref  : (Hp, OUT_PAD)      gmm head weights, zero-padded columns
    bg_ref  : (1, OUT_PAD)       gmm head bias, zero-padded, f32
    out_ref : (T, Bb, OUT_PAD)   gmm head output (lane-dense store), f32
    h_ref, c_ref : (Bb, Hp)      recurrent state carried across chunks
    hbuf_ref: (T*Bb, Hp)         per-step hidden states (matmul dtype)
    xw_ref  : (T*Bb, 4*Hp)       hoisted input projection, f32
    """
    chunk = pl.program_id(1)                      # time-chunk axis

    @pl.when(chunk == 0)
    def _():
        h_ref[...] = jnp.zeros_like(h_ref)
        c_ref[...] = jnp.zeros_like(c_ref)

    Bb, Hp = h_ref.shape
    T = x_ref.shape[0]
    H3 = 3 * Hp
    cdt = wih_ref.dtype                           # matmul operand dtype

    # (1) Hoisted input projection: ONE chunk-wide matmul + folded bias,
    #     staged into VMEM scratch for the serial loop to consume.
    x2 = x_ref[...].reshape(T * Bb, x_ref.shape[2]).astype(cdt)
    xw_ref[...] = (jnp.dot(x2, wih_ref[...],
                           preferred_element_type=jnp.float32) + b_ref[...])

    def lstm_step(xw_t, h, c):
        # Only h @ Whh + gate math stays on the serial time chain.
        gates = xw_t + jnp.dot(h.astype(cdt), whh_ref[...],
                               preferred_element_type=jnp.float32)
        # Gates pre-ordered [i|f|o|g]: sigmoid over 3*Hp, tanh over Hp.
        # All slice boundaries are multiples of 128 lanes (free selections).
        sg = jax.nn.sigmoid(gates[:, :H3])
        g_g = jnp.tanh(gates[:, H3:])
        i_g = sg[:, 0 * Hp:1 * Hp]
        f_g = sg[:, 1 * Hp:2 * Hp]
        o_g = sg[:, 2 * Hp:3 * Hp]
        c = f_g * c + i_g * g_g
        h = o_g * jnp.tanh(c)
        return h, c

    h = h_ref[...]
    c = c_ref[...]
    if T <= 16:
        # Small chunk: fully unrolled, static sublane-aligned slices.
        for t in range(T):
            h, c = lstm_step(xw_ref[t * Bb:(t + 1) * Bb, :], h, c)
            hbuf_ref[t * Bb:(t + 1) * Bb, :] = h.astype(hbuf_ref.dtype)
    else:
        # Production chunk: bounded vreg pressure via modestly-unrolled loop.
        def body(t, carry):
            hh, cc = carry
            row = pl.multiple_of(t * Bb, Bb)
            hh, cc = lstm_step(xw_ref[pl.ds(row, Bb), :], hh, cc)
            hbuf_ref[pl.ds(row, Bb), :] = hh.astype(hbuf_ref.dtype)
            return (hh, cc)
        h, c = jax.lax.fori_loop(0, T, body, (h, c), unroll=4)

    h_ref[...] = h
    c_ref[...] = c

    # (2) Hoisted gmm_linear head: ONE chunk-wide matmul, lane-dense store.
    out = (jnp.dot(hbuf_ref[...], wg_ref[...],
                   preferred_element_type=jnp.float32) + bg_ref[...])
    out_ref[...] = out.reshape(out_ref.shape)


# --------------------------------------------------------------------------
# Wrapper
# --------------------------------------------------------------------------
def _round_up(x, m):
    return ((x + m - 1) // m) * m


def _reorder_pad_gates(w, H, H_pad):
    """Columns [i|f|g|o] * H  ->  [i|f|o|g] * H_pad (zero-padded per gate).

    Puts the three sigmoid gates first so the kernel applies sigmoid to one
    contiguous 3*H_pad slice and tanh to the trailing H_pad slice, with all
    slice boundaries on 128-lane multiples.
    """
    i = w[..., 0 * H:1 * H]
    f = w[..., 1 * H:2 * H]
    g = w[..., 2 * H:3 * H]
    o = w[..., 3 * H:4 * H]
    pad = [(0, 0)] * (w.ndim - 1) + [(0, H_pad - H)]
    return jnp.concatenate([jnp.pad(b, pad) for b in (i, f, o, g)], axis=-1)


def mdrnn_forward(actions, latents, params, *, latents_dim, gaussians,
                  t_chunk=None, b_block=None, matmul_dtype=jnp.float32,
                  vmem_budget_bytes=48 << 20, single_buffer_weights=False):
    """MDRNN multi-step forward.  Returns (mus, sigmas, logpi, rs, ds)."""
    ins = jnp.concatenate([actions, latents], axis=-1).astype(jnp.float32)
    S, B, IN = ins.shape
    H = params["whh_t"].shape[0]
    OUT = params["wg_t"].shape[1]

    H_pad = _round_up(H, 128)                    # lane-aligned hidden size
    OUT_PAD = _round_up(OUT, 128)                # lane-dense output store
    B_pad = _round_up(B, 8)                      # sublane-aligned batch

    if b_block is None:
        b_block = B_pad                          # set B_pad//2 on v7x to use both TCs
    assert b_block % 8 == 0 and B_pad % b_block == 0
    n_bb = B_pad // b_block

    # --- VMEM-budget-driven chunk sizing ---------------------------------
    io = jnp.dtype(matmul_dtype).itemsize
    wbuf = 1 if single_buffer_weights else 2
    w_bytes = wbuf * ((IN * 4 * H_pad + H_pad * 4 * H_pad + H_pad * OUT_PAD) * io
                      + (4 * H_pad + OUT_PAD) * 4)
    state_bytes = 2 * b_block * H_pad * 4
    per_t = b_block * (2 * IN * 4            # x chunk (f32, double-buffered)
                       + 2 * OUT_PAD * 4     # out chunk (f32, double-buffered)
                       + 4 * H_pad * 4       # xw scratch (f32)
                       + H_pad * io)         # hbuf scratch
    if t_chunk is None:
        budget = max(vmem_budget_bytes - w_bytes - state_bytes, per_t)
        t_chunk = int(max(1, min(S, budget // per_t)))
        while S % t_chunk:                   # snap to a divisor of S
            t_chunk -= 1
    # TODO(synk): ragged-tail handling (pad + mask final chunk) for S % t_chunk != 0.
    assert S % t_chunk == 0
    n_chunks = S // t_chunk
    TB = t_chunk * b_block
    vmem_limit = int(min(max(2 * (w_bytes + state_bytes + t_chunk * per_t),
                             32 << 20), 48 << 20))

    # --- Parameter prep: gate reorder + padding (+ optional bf16) --------
    cast = lambda a: a.astype(matmul_dtype)
    x3d = jnp.pad(ins, ((0, 0), (0, B_pad - B), (0, 0)))            # f32
    wih_p = cast(_reorder_pad_gates(params["wih_t"], H, H_pad))
    whh_p = cast(_reorder_pad_gates(
        jnp.pad(params["whh_t"], ((0, H_pad - H), (0, 0))), H, H_pad))
    bias_p = _reorder_pad_gates(params["bih"] + params["bhh"], H, H_pad)
    wg_p = cast(jnp.pad(params["wg_t"], ((0, H_pad - H), (0, OUT_PAD - OUT))))
    bg_p = jnp.pad(params["bg"], ((0, 0), (0, OUT_PAD - OUT)))

    # Constant-index weight specs: optional single-buffering (v7x VMEM).
    wmode = dict(pipeline_mode=pl.Buffered(1)) if single_buffer_weights else {}

    out3d = pl.pallas_call(
        mdrnn_kernel,
        out_shape=jax.ShapeDtypeStruct((S, B_pad, OUT_PAD), jnp.float32),
        grid_spec=pltpu.PrefetchScalarGridSpec(
            num_scalar_prefetch=0,
            grid=(n_bb, n_chunks),
            in_specs=[
                pl.BlockSpec((t_chunk, b_block, IN), lambda bb, i: (i, bb, 0)),
                pl.BlockSpec((IN, 4 * H_pad), lambda bb, i: (0, 0), **wmode),
                pl.BlockSpec((H_pad, 4 * H_pad), lambda bb, i: (0, 0), **wmode),
                pl.BlockSpec((1, 4 * H_pad), lambda bb, i: (0, 0), **wmode),
                pl.BlockSpec((H_pad, OUT_PAD), lambda bb, i: (0, 0), **wmode),
                pl.BlockSpec((1, OUT_PAD), lambda bb, i: (0, 0), **wmode),
            ],
            out_specs=pl.BlockSpec((t_chunk, b_block, OUT_PAD),
                                   lambda bb, i: (i, bb, 0)),
            scratch_shapes=[
                pltpu.VMEM((b_block, H_pad), jnp.float32),   # h carry
                pltpu.VMEM((b_block, H_pad), jnp.float32),   # c carry
                pltpu.VMEM((TB, H_pad), matmul_dtype),       # per-chunk hiddens
                pltpu.VMEM((TB, 4 * H_pad), jnp.float32),    # hoisted x @ Wih
            ],
        ),
        compiler_params=pltpu.CompilerParams(
            # batch blocks are independent (v7x megacore); time is sequential
            dimension_semantics=("parallel", "arbitrary"),
            vmem_limit_bytes=vmem_limit),
    )(x3d, wih_p, whh_p, bias_p, wg_p, bg_p)

    gmm_outs = out3d[:, :B, :OUT]

    stride = gaussians * latents_dim
    mus = gmm_outs[:, :, :stride].reshape(S, B, gaussians, latents_dim)
    sigmas = jnp.exp(
        gmm_outs[:, :, stride:2 * stride].reshape(S, B, gaussians, latents_dim))
    pi = gmm_outs[:, :, 2 * stride:2 * stride + gaussians]
    logpi = jax.nn.log_softmax(pi, axis=-1)
    rs = gmm_outs[:, :, -2]
    ds = gmm_outs[:, :, -1]
    return mus, sigmas, logpi, rs, ds


# --------------------------------------------------------------------------
# Params + pure-JAX reference
# --------------------------------------------------------------------------
def init_params(key, latents_dim, actions_dim, hiddens, gaussians):
    IN = latents_dim + actions_dim
    H = hiddens
    OUT = (2 * latents_dim + 1) * gaussians + 2
    ks = jax.random.split(key, 6)
    s = 1.0 / jnp.sqrt(H)
    return {
        # pre-transposed weights: (in_features, out_features), gates [i|f|g|o]
        "wih_t": jax.random.uniform(ks[0], (IN, 4 * H), jnp.float32, -s, s),
        "whh_t": jax.random.uniform(ks[1], (H, 4 * H), jnp.float32, -s, s),
        "bih":   jax.random.uniform(ks[2], (1, 4 * H), jnp.float32, -s, s),
        "bhh":   jax.random.uniform(ks[3], (1, 4 * H), jnp.float32, -s, s),
        "wg_t":  jax.random.uniform(ks[4], (H, OUT), jnp.float32, -s, s),
        "bg":    jax.random.uniform(ks[5], (1, OUT), jnp.float32, -s, s),
    }


def mdrnn_forward_ref(actions, latents, params, *, latents_dim, gaussians):
    """Pure-JAX reference (lax.scan LSTM) for correctness checking."""
    ins = jnp.concatenate([actions, latents], axis=-1).astype(jnp.float32)
    S, B, _ = ins.shape
    H = params["whh_t"].shape[0]

    def step(carry, x):
        h, c = carry
        gates = (x @ params["wih_t"] + h @ params["whh_t"]
                 + params["bih"][0] + params["bhh"][0])
        i = jax.nn.sigmoid(gates[:, 0 * H:1 * H])
        f = jax.nn.sigmoid(gates[:, 1 * H:2 * H])
        g = jnp.tanh(gates[:, 2 * H:3 * H])
        o = jax.nn.sigmoid(gates[:, 3 * H:4 * H])
        c = f * c + i * g
        h = o * jnp.tanh(c)
        return (h, c), h

    h0 = jnp.zeros((B, H), jnp.float32)
    _, outs = jax.lax.scan(step, (h0, h0), ins)
    gmm_outs = outs @ params["wg_t"] + params["bg"][0]

    stride = gaussians * latents_dim
    mus = gmm_outs[:, :, :stride].reshape(S, B, gaussians, latents_dim)
    sigmas = jnp.exp(
        gmm_outs[:, :, stride:2 * stride].reshape(S, B, gaussians, latents_dim))
    logpi = jax.nn.log_softmax(
        gmm_outs[:, :, 2 * stride:2 * stride + gaussians], axis=-1)
    return mus, sigmas, logpi, gmm_outs[:, :, -2], gmm_outs[:, :, -1]


# --------------------------------------------------------------------------
# Demo / correctness checks
# --------------------------------------------------------------------------
if __name__ == "__main__":
    LATENTS, ACTIONS, HIDDENS, GAUSSIANS = 8, 4, 32, 5
    SEQ, BS = 8, 2

    key = jax.random.PRNGKey(0)
    k_act, k_lat, k_par, k_act2, k_lat2 = jax.random.split(key, 5)
    actions = jax.random.normal(k_act, (SEQ, BS, ACTIONS), jnp.float32)
    latents = jax.random.normal(k_lat, (SEQ, BS, LATENTS), jnp.float32)
    params = init_params(k_par, LATENTS, ACTIONS, HIDDENS, GAUSSIANS)

    ref = mdrnn_forward_ref(
        actions, latents, params, latents_dim=LATENTS, gaussians=GAUSSIANS)

    # (a) f32 matmul path, single chunk.
    outs = mdrnn_forward(
        actions, latents, params, latents_dim=LATENTS, gaussians=GAUSSIANS)
    jax.block_until_ready(outs)
    for got, want in zip(outs, ref):
        assert got.shape == want.shape
        assert jnp.allclose(got, want, atol=1e-3, rtol=1e-3)

    # (b) f32, multi-chunk: exercises the h/c carry across grid steps.
    outs_mc = mdrnn_forward(
        actions, latents, params, latents_dim=LATENTS, gaussians=GAUSSIANS,
        t_chunk=4)
    jax.block_until_ready(outs_mc)
    for got, want in zip(outs_mc, ref):
        assert jnp.allclose(got, want, atol=1e-3, rtol=1e-3)

    # (c) bf16 MXU operands (v6e/v7x fast path): loose tolerance check.
    outs_bf = mdrnn_forward(
        actions, latents, params, latents_dim=LATENTS, gaussians=GAUSSIANS,
        matmul_dtype=jnp.bfloat16)
    jax.block_until_ready(outs_bf)
    for got, want in zip(outs_bf, ref):
        assert got.shape == want.shape
        assert bool(jnp.all(jnp.isfinite(got)))
        assert jnp.allclose(got, want, atol=1e-1, rtol=1e-1)

    # (d) Batch-block parallel axis (v7x two-TC sharding pattern).
    BS2 = 16
    actions2 = jax.random.normal(k_act2, (SEQ, BS2, ACTIONS), jnp.float32)
    latents2 = jax.random.normal(k_lat2, (SEQ, BS2, LATENTS), jnp.float32)
    ref2 = mdrnn_forward_ref(
        actions2, latents2, params, latents_dim=LATENTS, gaussians=GAUSSIANS)
    outs2 = mdrnn_forward(
        actions2, latents2, params, latents_dim=LATENTS, gaussians=GAUSSIANS,
        b_block=8)
    jax.block_until_ready(outs2)
    for got, want in zip(outs2, ref2):
        assert got.shape == want.shape
        assert jnp.allclose(got, want, atol=1e-3, rtol=1e-3)

    mus, sigmas, logpi, rs, ds = outs
    assert mus.shape == (SEQ, BS, GAUSSIANS, LATENTS)
    assert sigmas.shape == (SEQ, BS, GAUSSIANS, LATENTS)
    assert logpi.shape == (SEQ, BS, GAUSSIANS)
    assert rs.shape == (SEQ, BS)
    assert ds.shape == (SEQ, BS)

    print("KERNEL_OK")
</pallas_src>

<mosaic_0001>
module attributes {stable_mosaic.version = 11 : i64} {
  func.func @mdrnn_kernel(%arg0: i32, %arg1: i32, %arg2: memref<8x8x12xf32, #tpu.memory_space<vmem>>, %arg3: memref<12x512xf32, #tpu.memory_space<vmem>>, %arg4: memref<128x512xf32, #tpu.memory_space<vmem>>, %arg5: memref<1x512xf32, #tpu.memory_space<vmem>>, %arg6: memref<128x128xf32, #tpu.memory_space<vmem>>, %arg7: memref<1x128xf32, #tpu.memory_space<vmem>>, %arg8: memref<8x8x128xf32, #tpu.memory_space<vmem>>, %arg9: memref<8x128xf32, #tpu.memory_space<vmem>>, %arg10: memref<8x128xf32, #tpu.memory_space<vmem>>, %arg11: memref<64x128xf32, #tpu.memory_space<vmem>>, %arg12: memref<64x512xf32, #tpu.memory_space<vmem>>) attributes {dimension_semantics = [#tpu.dimension_semantics<parallel>, #tpu.dimension_semantics<arbitrary>], iteration_bounds = array<i64: 1, 1>, scalar_prefetch = 0 : i64, scratch_operands = 4 : i64, tpu.core_type = #tpu.core_type<tc>, window_params = [{transform_indices = @transform_0, window_bounds = array<i64: 8, 8, 12>}, {pipeline_mode = #tpu.pipeline_mode<synchronous>, transform_indices = @transform_1, window_bounds = array<i64: 12, 512>}, {pipeline_mode = #tpu.pipeline_mode<synchronous>, transform_indices = @transform_2, window_bounds = array<i64: 128, 512>}, {pipeline_mode = #tpu.pipeline_mode<synchronous>, transform_indices = @transform_3, window_bounds = array<i64: 1, 512>}, {pipeline_mode = #tpu.pipeline_mode<synchronous>, transform_indices = @transform_4, window_bounds = array<i64: 128, 128>}, {pipeline_mode = #tpu.pipeline_mode<synchronous>, transform_indices = @transform_5, window_bounds = array<i64: 1, 128>}, {transform_indices = @transform_6, window_bounds = array<i64: 8, 8, 128>}]} {
    %c0_i32 = arith.constant 0 : i32
    %0 = arith.cmpi eq, %arg1, %c0_i32 : i32
    %1 = arith.extui %0 : i1 to i32
    %c0_i32_0 = arith.constant 0 : i32
    %2 = arith.cmpi ne, %1, %c0_i32_0 : i32
    scf.if %2 {
      %cst_84 = arith.constant 0.000000e+00 : f32
      %191 = vector.broadcast %cst_84 : f32 to vector<8x128xf32>
      %c0_85 = arith.constant 0 : index
      %c0_86 = arith.constant 0 : index
      %192 = vector.load %arg9[%c0_85, %c0_86] : memref<8x128xf32, #tpu.memory_space<vmem>>, vector<8x128xf32>
      tpu.vector_store %arg9[%c0_85, %c0_86], %191 {strides = array<i32>} : memref<8x128xf32, #tpu.memory_space<vmem>>, vector<8x128xf32>,
      %cst_87 = arith.constant 0.000000e+00 : f32
      %193 = vector.broadcast %cst_87 : f32 to vector<8x128xf32>
      %c0_88 = arith.constant 0 : index
      %c0_89 = arith.constant 0 : index
      %194 = vector.load %arg10[%c0_88, %c0_89] : memref<8x128xf32, #tpu.memory_space<vmem>>, vector<8x128xf32>
      tpu.vector_store %arg10[%c0_88, %c0_89], %193 {strides = array<i32>} : memref<8x128xf32, #tpu.memory_space<vmem>>, vector<8x128xf32>,
    } else {
    }
    %c0 = arith.constant 0 : index
    %c0_1 = arith.constant 0 : index
    %c0_2 = arith.constant 0 : index
    %3 = vector.load %arg2[%c0, %c0_1, %c0_2] : memref<8x8x12xf32, #tpu.memory_space<vmem>>, vector<8x8x12xf32>
    %4 = vector.shape_cast %3 : vector<8x8x12xf32> to vector<64x12xf32>
    %c0_3 = arith.constant 0 : index
    %c0_4 = arith.constant 0 : index
    %5 = vector.load %arg3[%c0_3, %c0_4] : memref<12x512xf32, #tpu.memory_space<vmem>>, vector<12x512xf32>
    %cst = arith.constant dense<0.000000e+00> : vector<64x512xf32>
    %6 = tpu.matmul %4, %5, %cst {dimension_numbers = #tpu.dot_dimension_numbers<[1], [0], [0], [1], [0, 0, 1, 1], [], []>} : vector<64x12xf32>, vector<12x512xf32>, vector<64x512xf32> -> vector<64x512xf32>
    %c0_5 = arith.constant 0 : index
    %c0_6 = arith.constant 0 : index
    %7 = vector.load %arg5[%c0_5, %c0_6] : memref<1x512xf32, #tpu.memory_space<vmem>>, vector<1x512xf32>
    %8 = vector.broadcast %7 : vector<1x512xf32> to vector<64x512xf32>
    %9 = arith.addf %6, %8 : vector<64x512xf32>
    %c0_7 = arith.constant 0 : index
    %c0_8 = arith.constant 0 : index
    %10 = vector.load %arg12[%c0_7, %c0_8] : memref<64x512xf32, #tpu.memory_space<vmem>>, vector<64x512xf32>
    tpu.vector_store %arg12[%c0_7, %c0_8], %9 {strides = array<i32>} : memref<64x512xf32, #tpu.memory_space<vmem>>, vector<64x512xf32>,
    %c0_9 = arith.constant 0 : index
    %c0_10 = arith.constant 0 : index
    %11 = vector.load %arg9[%c0_9, %c0_10] : memref<8x128xf32, #tpu.memory_space<vmem>>, vector<8x128xf32>
    %c0_11 = arith.constant 0 : index
    %c0_12 = arith.constant 0 : index
    %12 = vector.load %arg10[%c0_11, %c0_12] : memref<8x128xf32, #tpu.memory_space<vmem>>, vector<8x128xf32>
    %c0_13 = arith.constant 0 : index
    %c0_14 = arith.constant 0 : index
    %13 = vector.load %arg12[%c0_13, %c0_14] : memref<64x512xf32, #tpu.memory_space<vmem>>, vector<8x512xf32>
    %c0_15 = arith.constant 0 : index
    %c0_16 = arith.constant 0 : index
    %14 = vector.load %arg4[%c0_15, %c0_16] : memref<128x512xf32, #tpu.memory_space<vmem>>, vector<128x512xf32>
    %cst_17 = arith.constant dense<0.000000e+00> : vector<8x512xf32>
    %15 = tpu.matmul %11, %14, %cst_17 {dimension_numbers = #tpu.dot_dimension_numbers<[1], [0], [0], [1], [0, 0, 1, 1], [], []>} : vector<8x128xf32>, vector<128x512xf32>, vector<8x512xf32> -> vector<8x512xf32>
    %16 = arith.addf %13, %15 : vector<8x512xf32>
    %17 = vector.extract_strided_slice %16 {offsets = [0, 0], sizes = [8, 384], strides = [1, 1]} : vector<8x512xf32> to vector<8x384xf32>
    %18 = arith.negf %17 : vector<8x384xf32>
    %19 = math.exp %18 : vector<8x384xf32>
    %cst_18 = arith.constant 1.000000e+00 : f32
    %20 = vector.broadcast %cst_18 : f32 to vector<8x384xf32>
    %21 = arith.addf %20, %19 : vector<8x384xf32>
    %22 = arith.divf %20, %21 : vector<8x384xf32>
    %23 = vector.extract_strided_slice %16 {offsets = [0, 384], sizes = [8, 128], strides = [1, 1]} : vector<8x512xf32> to vector<8x128xf32>
    %24 = math.tanh %23 : vector<8x128xf32>
    %25 = vector.extract_strided_slice %22 {offsets = [0, 0], sizes = [8, 128], strides = [1, 1]} : vector<8x384xf32> to vector<8x128xf32>
    %26 = vector.extract_strided_slice %22 {offsets = [0, 128], sizes = [8, 128], strides = [1, 1]} : vector<8x384xf32> to vector<8x128xf32>
    %27 = vector.extract_strided_slice %22 {offsets = [0, 256], sizes = [8, 128], strides = [1, 1]} : vector<8x384xf32> to vector<8x128xf32>
    %28 = arith.mulf %26, %12 : vector<8x128xf32>
    %29 = arith.mulf %25, %24 : vector<8x128xf32>
    %30 = arith.addf %28, %29 : vector<8x128xf32>
    %31 = math.tanh %30 : vector<8x128xf32>
    %32 = arith.mulf %27, %31 : vector<8x128xf32>
    %c0_19 = arith.constant 0 : index
    %c0_20 = arith.constant 0 : index
    %33 = vector.load %arg11[%c0_19, %c0_20] : memref<64x128xf32, #tpu.memory_space<vmem>>, vector<8x128xf32>
    tpu.vector_store %arg11[%c0_19, %c0_20], %32 {strides = array<i32>} : memref<64x128xf32, #tpu.memory_space<vmem>>, vector<8x128xf32>,
    %c8 = arith.constant 8 : index
    %c0_21 = arith.constant 0 : index
    %34 = vector.load %arg12[%c8, %c0_21] : memref<64x512xf32, #tpu.memory_space<vmem>>, vector<8x512xf32>
    %c0_22 = arith.constant 0 : index
    %c0_23 = arith.constant 0 : index
    %35 = vector.load %arg4[%c0_22, %c0_23] : memref<128x512xf32, #tpu.memory_space<vmem>>, vector<128x512xf32>
    %cst_24 = arith.constant dense<0.000000e+00> : vector<8x512xf32>
    %36 = tpu.matmul %32, %35, %cst_24 {dimension_numbers = #tpu.dot_dimension_numbers<[1], [0], [0], [1], [0, 0, 1, 1], [], []>} : vector<8x128xf32>, vector<128x512xf32>, vector<8x512xf32> -> vector<8x512xf32>
    %37 = arith.addf %34, %36 : vector<8x512xf32>
    %38 = vector.extract_strided_slice %37 {offsets = [0, 0], sizes = [8, 384], strides = [1, 1]} : vector<8x512xf32> to vector<8x384xf32>
    %39 = arith.negf %38 : vector<8x384xf32>
    %40 = math.exp %39 : vector<8x384xf32>
    %cst_25 = arith.constant 1.000000e+00 : f32
    %41 = vector.broadcast %cst_25 : f32 to vector<8x384xf32>
    %42 = arith.addf %41, %40 : vector<8x384xf32>
    %43 = arith.divf %41, %42 : vector<8x384xf32>
    %44 = vector.extract_strided_slice %37 {offsets = [0, 384], sizes = [8, 128], strides = [1, 1]} : vector<8x512xf32> to vector<8x128xf32>
    %45 = math.tanh %44 : vector<8x128xf32>
    %46 = vector.extract_strided_slice %43 {offsets = [0, 0], sizes = [8, 128], strides = [1, 1]} : vector<8x384xf32> to vector<8x128xf32>
    %47 = vector.extract_strided_slice %43 {offsets = [0, 128], sizes = [8, 128], strides = [1, 1]} : vector<8x384xf32> to vector<8x128xf32>
    %48 = vector.extract_strided_slice %43 {offsets = [0, 256], sizes = [8, 128], strides = [1, 1]} : vector<8x384xf32> to vector<8x128xf32>
    %49 = arith.mulf %47, %30 : vector<8x128xf32>
    %50 = arith.mulf %46, %45 : vector<8x128xf32>
    %51 = arith.addf %49, %50 : vector<8x128xf32>
    %52 = math.tanh %51 : vector<8x128xf32>
    %53 = arith.mulf %48, %52 : vector<8x128xf32>
    %c8_26 = arith.constant 8 : index
    %c0_27 = arith.constant 0 : index
    %54 = vector.load %arg11[%c8_26, %c0_27] : memref<64x128xf32, #tpu.memory_space<vmem>>, vector<8x128xf32>
    tpu.vector_store %arg11[%c8_26, %c0_27], %53 {strides = array<i32>} : memref<64x128xf32, #tpu.memory_space<vmem>>, vector<8x128xf32>,
    %c16 = arith.constant 16 : index
    %c0_28 = arith.constant 0 : index
    %55 = vector.load %arg12[%c16, %c0_28] : memref<64x512xf32, #tpu.memory_space<vmem>>, vector<8x512xf32>
    %c0_29 = arith.constant 0 : index
    %c0_30 = arith.constant 0 : index
    %56 = vector.load %arg4[%c0_29, %c0_30] : memref<128x512xf32, #tpu.memory_space<vmem>>, vector<128x512xf32>
    %cst_31 = arith.constant dense<0.000000e+00> : vector<8x512xf32>
    %57 = tpu.matmul %53, %56, %cst_31 {dimension_numbers = #tpu.dot_dimension_numbers<[1], [0], [0], [1], [0, 0, 1, 1], [], []>} : vector<8x128xf32>, vector<128x512xf32>, vector<8x512xf32> -> vector<8x512xf32>
    %58 = arith.addf %55, %57 : vector<8x512xf32>
    %59 = vector.extract_strided_slice %58 {offsets = [0, 0], sizes = [8, 384], strides = [1, 1]} : vector<8x512xf32> to vector<8x384xf32>
    %60 = arith.negf %59 : vector<8x384xf32>
    %61 = math.exp %60 : vector<8x384xf32>
    %cst_32 = arith.constant 1.000000e+00 : f32
    %62 = vector.broadcast %cst_32 : f32 to vector<8x384xf32>
    %63 = arith.addf %62, %61 : vector<8x384xf32>
    %64 = arith.divf %62, %63 : vector<8x384xf32>
    %65 = vector.extract_strided_slice %58 {offsets = [0, 384], sizes = [8, 128], strides = [1, 1]} : vector<8x512xf32> to vector<8x128xf32>
    %66 = math.tanh %65 : vector<8x128xf32>
    %67 = vector.extract_strided_slice %64 {offsets = [0, 0], sizes = [8, 128], strides = [1, 1]} : vector<8x384xf32> to vector<8x128xf32>
    %68 = vector.extract_strided_slice %64 {offsets = [0, 128], sizes = [8, 128], strides = [1, 1]} : vector<8x384xf32> to vector<8x128xf32>
    %69 = vector.extract_strided_slice %64 {offsets = [0, 256], sizes = [8, 128], strides = [1, 1]} : vector<8x384xf32> to vector<8x128xf32>
    %70 = arith.mulf %68, %51 : vector<8x128xf32>
    %71 = arith.mulf %67, %66 : vector<8x128xf32>
    %72 = arith.addf %70, %71 : vector<8x128xf32>
    %73 = math.tanh %72 : vector<8x128xf32>
    %74 = arith.mulf %69, %73 : vector<8x128xf32>
    %c16_33 = arith.constant 16 : index
    %c0_34 = arith.constant 0 : index
    %75 = vector.load %arg11[%c16_33, %c0_34] : memref<64x128xf32, #tpu.memory_space<vmem>>, vector<8x128xf32>
    tpu.vector_store %arg11[%c16_33, %c0_34], %74 {strides = array<i32>} : memref<64x128xf32, #tpu.memory_space<vmem>>, vector<8x128xf32>,
    %c24 = arith.constant 24 : index
    %c0_35 = arith.constant 0 : index
    %76 = vector.load %arg12[%c24, %c0_35] : memref<64x512xf32, #tpu.memory_space<vmem>>, vector<8x512xf32>
    %c0_36 = arith.constant 0 : index
    %c0_37 = arith.constant 0 : index
    %77 = vector.load %arg4[%c0_36, %c0_37] : memref<128x512xf32, #tpu.memory_space<vmem>>, vector<128x512xf32>
    %cst_38 = arith.constant dense<0.000000e+00> : vector<8x512xf32>
    %78 = tpu.matmul %74, %77, %cst_38 {dimension_numbers = #tpu.dot_dimension_numbers<[1], [0], [0], [1], [0, 0, 1, 1], [], []>} : vector<8x128xf32>, vector<128x512xf32>, vector<8x512xf32> -> vector<8x512xf32>
    %79 = arith.addf %76, %78 : vector<8x512xf32>
    %80 = vector.extract_strided_slice %79 {offsets = [0, 0], sizes = [8, 384], strides = [1, 1]} : vector<8x512xf32> to vector<8x384xf32>
    %81 = arith.negf %80 : vector<8x384xf32>
    %82 = math.exp %81 : vector<8x384xf32>
    %cst_39 = arith.constant 1.000000e+00 : f32
    %83 = vector.broadcast %cst_39 : f32 to vector<8x384xf32>
    %84 = arith.addf %83, %82 : vector<8x384xf32>
    %85 = arith.divf %83, %84 : vector<8x384xf32>
    %86 = vector.extract_strided_slice %79 {offsets = [0, 384], sizes = [8, 128], strides = [1, 1]} : vector<8x512xf32> to vector<8x128xf32>
    %87 = math.tanh %86 : vector<8x128xf32>
    %88 = vector.extract_strided_slice %85 {offsets = [0, 0], sizes = [8, 128], strides = [1, 1]} : vector<8x384xf32> to vector<8x128xf32>
    %89 = vector.extract_strided_slice %85 {offsets = [0, 128], sizes = [8, 128], strides = [1, 1]} : vector<8x384xf32> to vector<8x128xf32>
    %90 = vector.extract_strided_slice %85 {offsets = [0, 256], sizes = [8, 128], strides = [1, 1]} : vector<8x384xf32> to vector<8x128xf32>
    %91 = arith.mulf %89, %72 : vector<8x128xf32>
    %92 = arith.mulf %88, %87 : vector<8x128xf32>
    %93 = arith.addf %91, %92 : vector<8x128xf32>
    %94 = math.tanh %93 : vector<8x128xf32>
    %95 = arith.mulf %90, %94 : vector<8x128xf32>
    %c24_40 = arith.constant 24 : index
    %c0_41 = arith.constant 0 : index
    %96 = vector.load %arg11[%c24_40, %c0_41] : memref<64x128xf32, #tpu.memory_space<vmem>>, vector<8x128xf32>
    tpu.vector_store %arg11[%c24_40, %c0_41], %95 {strides = array<i32>} : memref<64x128xf32, #tpu.memory_space<vmem>>, vector<8x128xf32>,
    %c32 = arith.constant 32 : index
    %c0_42 = arith.constant 0 : index
    %97 = vector.load %arg12[%c32, %c0_42] : memref<64x512xf32, #tpu.memory_space<vmem>>, vector<8x512xf32>
    %c0_43 = arith.constant 0 : index
    %c0_44 = arith.constant 0 : index
    %98 = vector.load %arg4[%c0_43, %c0_44] : memref<128x512xf32, #tpu.memory_space<vmem>>, vector<128x512xf32>
    %cst_45 = arith.constant dense<0.000000e+00> : vector<8x512xf32>
    %99 = tpu.matmul %95, %98, %cst_45 {dimension_numbers = #tpu.dot_dimension_numbers<[1], [0], [0], [1], [0, 0, 1, 1], [], []>} : vector<8x128xf32>, vector<128x512xf32>, vector<8x512xf32> -> vector<8x512xf32>
    %100 = arith.addf %97, %99 : vector<8x512xf32>
    %101 = vector.extract_strided_slice %100 {offsets = [0, 0], sizes = [8, 384], strides = [1, 1]} : vector<8x512xf32> to vector<8x384xf32>
    %102 = arith.negf %101 : vector<8x384xf32>
    %103 = math.exp %102 : vector<8x384xf32>
    %cst_46 = arith.constant 1.000000e+00 : f32
    %104 = vector.broadcast %cst_46 : f32 to vector<8x384xf32>
    %105 = arith.addf %104, %103 : vector<8x384xf32>
    %106 = arith.divf %104, %105 : vector<8x384xf32>
    %107 = vector.extract_strided_slice %100 {offsets = [0, 384], sizes = [8, 128], strides = [1, 1]} : vector<8x512xf32> to vector<8x128xf32>
    %108 = math.tanh %107 : vector<8x128xf32>
    %109 = vector.extract_strided_slice %106 {offsets = [0, 0], sizes = [8, 128], strides = [1, 1]} : vector<8x384xf32> to vector<8x128xf32>
    %110 = vector.extract_strided_slice %106 {offsets = [0, 128], sizes = [8, 128], strides = [1, 1]} : vector<8x384xf32> to vector<8x128xf32>
    %111 = vector.extract_strided_slice %106 {offsets = [0, 256], sizes = [8, 128], strides = [1, 1]} : vector<8x384xf32> to vector<8x128xf32>
    %112 = arith.mulf %110, %93 : vector<8x128xf32>
    %113 = arith.mulf %109, %108 : vector<8x128xf32>
    %114 = arith.addf %112, %113 : vector<8x128xf32>
    %115 = math.tanh %114 : vector<8x128xf32>
    %116 = arith.mulf %111, %115 : vector<8x128xf32>
    %c32_47 = arith.constant 32 : index
    %c0_48 = arith.constant 0 : index
    %117 = vector.load %arg11[%c32_47, %c0_48] : memref<64x128xf32, #tpu.memory_space<vmem>>, vector<8x128xf32>
    tpu.vector_store %arg11[%c32_47, %c0_48], %116 {strides = array<i32>} : memref<64x128xf32, #tpu.memory_space<vmem>>, vector<8x128xf32>,
    %c40 = arith.constant 40 : index
    %c0_49 = arith.constant 0 : index
    %118 = vector.load %arg12[%c40, %c0_49] : memref<64x512xf32, #tpu.memory_space<vmem>>, vector<8x512xf32>
    %c0_50 = arith.constant 0 : index
    %c0_51 = arith.constant 0 : index
    %119 = vector.load %arg4[%c0_50, %c0_51] : memref<128x512xf32, #tpu.memory_space<vmem>>, vector<128x512xf32>
    %cst_52 = arith.constant dense<0.000000e+00> : vector<8x512xf32>
    %120 = tpu.matmul %116, %119, %cst_52 {dimension_numbers = #tpu.dot_dimension_numbers<[1], [0], [0], [1], [0, 0, 1, 1], [], []>} : vector<8x128xf32>, vector<128x512xf32>, vector<8x512xf32> -> vector<8x512xf32>
    %121 = arith.addf %118, %120 : vector<8x512xf32>
    %122 = vector.extract_strided_slice %121 {offsets = [0, 0], sizes = [8, 384], strides = [1, 1]} : vector<8x512xf32> to vector<8x384xf32>
    %123 = arith.negf %122 : vector<8x384xf32>
    %124 = math.exp %123 : vector<8x384xf32>
    %cst_53 = arith.constant 1.000000e+00 : f32
    %125 = vector.broadcast %cst_53 : f32 to vector<8x384xf32>
    %126 = arith.addf %125, %124 : vector<8x384xf32>
    %127 = arith.divf %125, %126 : vector<8x384xf32>
    %128 = vector.extract_strided_slice %121 {offsets = [0, 384], sizes = [8, 128], strides = [1, 1]} : vector<8x512xf32> to vector<8x128xf32>
    %129 = math.tanh %128 : vector<8x128xf32>
    %130 = vector.extract_strided_slice %127 {offsets = [0, 0], sizes = [8, 128], strides = [1, 1]} : vector<8x384xf32> to vector<8x128xf32>
    %131 = vector.extract_strided_slice %127 {offsets = [0, 128], sizes = [8, 128], strides = [1, 1]} : vector<8x384xf32> to vector<8x128xf32>
    %132 = vector.extract_strided_slice %127 {offsets = [0, 256], sizes = [8, 128], strides = [1, 1]} : vector<8x384xf32> to vector<8x128xf32>
    %133 = arith.mulf %131, %114 : vector<8x128xf32>
    %134 = arith.mulf %130, %129 : vector<8x128xf32>
    %135 = arith.addf %133, %134 : vector<8x128xf32>
    %136 = math.tanh %135 : vector<8x128xf32>
    %137 = arith.mulf %132, %136 : vector<8x128xf32>
    %c40_54 = arith.constant 40 : index
    %c0_55 = arith.constant 0 : index
    %138 = vector.load %arg11[%c40_54, %c0_55] : memref<64x128xf32, #tpu.memory_space<vmem>>, vector<8x128xf32>
    tpu.vector_store %arg11[%c40_54, %c0_55], %137 {strides = array<i32>} : memref<64x128xf32, #tpu.memory_space<vmem>>, vector<8x128xf32>,
    %c48 = arith.constant 48 : index
    %c0_56 = arith.constant 0 : index
    %139 = vector.load %arg12[%c48, %c0_56] : memref<64x512xf32, #tpu.memory_space<vmem>>, vector<8x512xf32>
    %c0_57 = arith.constant 0 : index
    %c0_58 = arith.constant 0 : index
    %140 = vector.load %arg4[%c0_57, %c0_58] : memref<128x512xf32, #tpu.memory_space<vmem>>, vector<128x512xf32>
    %cst_59 = arith.constant dense<0.000000e+00> : vector<8x512xf32>
    %141 = tpu.matmul %137, %140, %cst_59 {dimension_numbers = #tpu.dot_dimension_numbers<[1], [0], [0], [1], [0, 0, 1, 1], [], []>} : vector<8x128xf32>, vector<128x512xf32>, vector<8x512xf32> -> vector<8x512xf32>
    %142 = arith.addf %139, %141 : vector<8x512xf32>
    %143 = vector.extract_strided_slice %142 {offsets = [0, 0], sizes = [8, 384], strides = [1, 1]} : vector<8x512xf32> to vector<8x384xf32>
    %144 = arith.negf %143 : vector<8x384xf32>
    %145 = math.exp %144 : vector<8x384xf32>
    %cst_60 = arith.constant 1.000000e+00 : f32
    %146 = vector.broadcast %cst_60 : f32 to vector<8x384xf32>
    %147 = arith.addf %146, %145 : vector<8x384xf32>
    %148 = arith.divf %146, %147 : vector<8x384xf32>
    %149 = vector.extract_strided_slice %142 {offsets = [0, 384], sizes = [8, 128], strides = [1, 1]} : vector<8x512xf32> to vector<8x128xf32>
    %150 = math.tanh %149 : vector<8x128xf32>
    %151 = vector.extract_strided_slice %148 {offsets = [0, 0], sizes = [8, 128], strides = [1, 1]} : vector<8x384xf32> to vector<8x128xf32>
    %152 = vector.extract_strided_slice %148 {offsets = [0, 128], sizes = [8, 128], strides = [1, 1]} : vector<8x384xf32> to vector<8x128xf32>
    %153 = vector.extract_strided_slice %148 {offsets = [0, 256], sizes = [8, 128], strides = [1, 1]} : vector<8x384xf32> to vector<8x128xf32>
    %154 = arith.mulf %152, %135 : vector<8x128xf32>
    %155 = arith.mulf %151, %150 : vector<8x128xf32>
    %156 = arith.addf %154, %155 : vector<8x128xf32>
    %157 = math.tanh %156 : vector<8x128xf32>
    %158 = arith.mulf %153, %157 : vector<8x128xf32>
    %c48_61 = arith.constant 48 : index
    %c0_62 = arith.constant 0 : index
    %159 = vector.load %arg11[%c48_61, %c0_62] : memref<64x128xf32, #tpu.memory_space<vmem>>, vector<8x128xf32>
    tpu.vector_store %arg11[%c48_61, %c0_62], %158 {strides = array<i32>} : memref<64x128xf32, #tpu.memory_space<vmem>>, vector<8x128xf32>,
    %c56 = arith.constant 56 : index
    %c0_63 = arith.constant 0 : index
    %160 = vector.load %arg12[%c56, %c0_63] : memref<64x512xf32, #tpu.memory_space<vmem>>, vector<8x512xf32>
    %c0_64 = arith.constant 0 : index
    %c0_65 = arith.constant 0 : index
    %161 = vector.load %arg4[%c0_64, %c0_65] : memref<128x512xf32, #tpu.memory_space<vmem>>, vector<128x512xf32>
    %cst_66 = arith.constant dense<0.000000e+00> : vector<8x512xf32>
    %162 = tpu.matmul %158, %161, %cst_66 {dimension_numbers = #tpu.dot_dimension_numbers<[1], [0], [0], [1], [0, 0, 1, 1], [], []>} : vector<8x128xf32>, vector<128x512xf32>, vector<8x512xf32> -> vector<8x512xf32>
    %163 = arith.addf %160, %162 : vector<8x512xf32>
    %164 = vector.extract_strided_slice %163 {offsets = [0, 0], sizes = [8, 384], strides = [1, 1]} : vector<8x512xf32> to vector<8x384xf32>
    %165 = arith.negf %164 : vector<8x384xf32>
    %166 = math.exp %165 : vector<8x384xf32>
    %cst_67 = arith.constant 1.000000e+00 : f32
    %167 = vector.broadcast %cst_67 : f32 to vector<8x384xf32>
    %168 = arith.addf %167, %166 : vector<8x384xf32>
    %169 = arith.divf %167, %168 : vector<8x384xf32>
    %170 = vector.extract_strided_slice %163 {offsets = [0, 384], sizes = [8, 128], strides = [1, 1]} : vector<8x512xf32> to vector<8x128xf32>
    %171 = math.tanh %170 : vector<8x128xf32>
    %172 = vector.extract_strided_slice %169 {offsets = [0, 0], sizes = [8, 128], strides = [1, 1]} : vector<8x384xf32> to vector<8x128xf32>
    %173 = vector.extract_strided_slice %169 {offsets = [0, 128], sizes = [8, 128], strides = [1, 1]} : vector<8x384xf32> to vector<8x128xf32>
    %174 = vector.extract_strided_slice %169 {offsets = [0, 256], sizes = [8, 128], strides = [1, 1]} : vector<8x384xf32> to vector<8x128xf32>
    %175 = arith.mulf %173, %156 : vector<8x128xf32>
    %176 = arith.mulf %172, %171 : vector<8x128xf32>
    %177 = arith.addf %175, %176 : vector<8x128xf32>
    %178 = math.tanh %177 : vector<8x128xf32>
    %179 = arith.mulf %174, %178 : vector<8x128xf32>
    %c56_68 = arith.constant 56 : index
    %c0_69 = arith.constant 0 : index
    %180 = vector.load %arg11[%c56_68, %c0_69] : memref<64x128xf32, #tpu.memory_space<vmem>>, vector<8x128xf32>
    tpu.vector_store %arg11[%c56_68, %c0_69], %179 {strides = array<i32>} : memref<64x128xf32, #tpu.memory_space<vmem>>, vector<8x128xf32>,
    %c0_70 = arith.constant 0 : index
    %c0_71 = arith.constant 0 : index
    %181 = vector.load %arg9[%c0_70, %c0_71] : memref<8x128xf32, #tpu.memory_space<vmem>>, vector<8x128xf32>
    tpu.vector_store %arg9[%c0_70, %c0_71], %179 {strides = array<i32>} : memref<8x128xf32, #tpu.memory_space<vmem>>, vector<8x128xf32>,
    %c0_72 = arith.constant 0 : index
    %c0_73 = arith.constant 0 : index
    %182 = vector.load %arg10[%c0_72, %c0_73] : memref<8x128xf32, #tpu.memory_space<vmem>>, vector<8x128xf32>
    tpu.vector_store %arg10[%c0_72, %c0_73], %177 {strides = array<i32>} : memref<8x128xf32, #tpu.memory_space<vmem>>, vector<8x128xf32>,
    %c0_74 = arith.constant 0 : index
    %c0_75 = arith.constant 0 : index
    %183 = vector.load %arg11[%c0_74, %c0_75] : memref<64x128xf32, #tpu.memory_space<vmem>>, vector<64x128xf32>
    %c0_76 = arith.constant 0 : index
    %c0_77 = arith.constant 0 : index
    %184 = vector.load %arg6[%c0_76, %c0_77] : memref<128x128xf32, #tpu.memory_space<vmem>>, vector<128x128xf32>
    %cst_78 = arith.constant dense<0.000000e+00> : vector<64x128xf32>
    %185 = tpu.matmul %183, %184, %cst_78 {dimension_numbers = #tpu.dot_dimension_numbers<[1], [0], [0], [1], [0, 0, 1, 1], [], []>} : vector<64x128xf32>, vector<128x128xf32>, vector<64x128xf32> -> vector<64x128xf32>
    %c0_79 = arith.constant 0 : index
    %c0_80 = arith.constant 0 : index
    %186 = vector.load %arg7[%c0_79, %c0_80] : memref<1x128xf32, #tpu.memory_space<vmem>>, vector<1x128xf32>
    %187 = vector.broadcast %186 : vector<1x128xf32> to vector<64x128xf32>
    %188 = arith.addf %185, %187 : vector<64x128xf32>
    %189 = vector.shape_cast %188 : vector<64x128xf32> to vector<8x8x128xf32>
    %c0_81 = arith.constant 0 : index
    %c0_82 = arith.constant 0 : index
    %c0_83 = arith.constant 0 : index
    %190 = vector.load %arg8[%c0_81, %c0_82, %c0_83] : memref<8x8x128xf32, #tpu.memory_space<vmem>>, vector<8x8x128xf32>
    tpu.vector_store %arg8[%c0_81, %c0_82, %c0_83], %189 {strides = array<i32>} : memref<8x8x128xf32, #tpu.memory_space<vmem>>, vector<8x8x128xf32>,
    return
  }
  func.func @transform_0(%arg0: i32, %arg1: i32) -> (i32, i32, i32) {
    %c0_i32 = arith.constant 0 : i32
    %c0_i32_0 = arith.constant 0 : i32
    return %arg1, %arg0, %c0_i32 : i32, i32, i32
  }
  func.func @transform_1(%arg0: i32, %arg1: i32) -> (i32, i32) {
    %c0_i32 = arith.constant 0 : i32
    %c0_i32_0 = arith.constant 0 : i32
    %c0_i32_1 = arith.constant 0 : i32
    return %c0_i32, %c0_i32_0 : i32, i32
  }
  func.func @transform_2(%arg0: i32, %arg1: i32) -> (i32, i32) {
    %c0_i32 = arith.constant 0 : i32
    %c0_i32_0 = arith.constant 0 : i32
    %c0_i32_1 = arith.constant 0 : i32
    return %c0_i32, %c0_i32_0 : i32, i32
  }
  func.func @transform_3(%arg0: i32, %arg1: i32) -> (i32, i32) {
    %c0_i32 = arith.constant 0 : i32
    %c0_i32_0 = arith.constant 0 : i32
    %c0_i32_1 = arith.constant 0 : i32
    return %c0_i32, %c0_i32_0 : i32, i32
  }
  func.func @transform_4(%arg0: i32, %arg1: i32) -> (i32, i32) {
    %c0_i32 = arith.constant 0 : i32
    %c0_i32_0 = arith.constant 0 : i32
    %c0_i32_1 = arith.constant 0 : i32
    return %c0_i32, %c0_i32_0 : i32, i32
  }
  func.func @transform_5(%arg0: i32, %arg1: i32) -> (i32, i32) {
    %c0_i32 = arith.constant 0 : i32
    %c0_i32_0 = arith.constant 0 : i32
    %c0_i32_1 = arith.constant 0 : i32
    return %c0_i32, %c0_i32_0 : i32, i32
  }
  func.func @transform_6(%arg0: i32, %arg1: i32) -> (i32, i32, i32) {
    %c0_i32 = arith.constant 0 : i32
    %c0_i32_0 = arith.constant 0 : i32
    return %arg1, %arg0, %c0_i32 : i32, i32, i32
  }
}

</mosaic_0001>

<bundles_post_ra>
// kernel: tpu_custom_call.1
= control target key start
LH: loop header
LB: loop body
LE: loop exit
PB: predicated region body
PF: predicated region fallthrough
CT: control target
= control target key end

     0   :  { %11 = vsyncpa [#allocation7], 0  ;;  %s4170_s0 = inlined_call_operand.hbm [shape: f32[8,8,12], index: 0, kind: input, shape index: {}]   ;;  %s4171_s1 = inlined_call_operand.hbm [shape: f32[12,512], index: 1, kind: input, shape index: {}]   ;;  %s4172_s2 = inlined_call_operand.hbm [shape: f32[128,512], index: 2, kind: input, shape index: {}]   ;;  %s4173_s3 = inlined_call_operand.vmem [shape: f32[1,512], index: 3, kind: input, shape index: {}]   ;;  %s4174_s4 = inlined_call_operand.hbm [shape: f32[128,128], index: 4, kind: input, shape index: {}]   ;;  %s4175_s5 = inlined_call_operand.vmem [shape: f32[1,128], index: 5, kind: input, shape index: {}]   ;;  %s4176_s6 = inlined_call_operand.hbm [shape: f32[8,8,128], index: 6, kind: output, shape index: {}]  }
   0x1   :  { %12 = vsyncpa [#allocation10], 0 }
   0x2   :  { %13 = vsyncpa [#allocation13], 0 }
   0x3   :  { %14 = vsyncpa [#allocation8], 0  ;;  %s3488_s21 = smov [#allocation9]   ;;  %s3370_s25 = scalar_lea.hbm %s4171_s1, 1024 }
   0x4   :  { %s32_s22 = sshll.u32 %s3488_s21, 4  ;;  %p3371_p0 = scmp.ne.s32.totalorder %s4171_s1, %s3370_s25  ;;  %s33_s22 = int_to_ptr.vmem [resolvable:$true] %s32_s22 }
   0x5   :  { %p3374_p1 = scmp.lt.u32.totalorder %s3370_s25, %s4171_s1 }
   0x7   :  { %p3376_p2 = pnand %p3374_p1, %p3371_p0 }
   0x9   :  { %3379 = shalt.err (!%p3376_p2)
}
   0xa   :  { %s3380_s30 = scalar_lea.vmem %s33_s22, 1024  ;;  %p3385_p4 = scmp.lt.s32.totalorder %s33_s22, %s33_s22 }
   0xb   :  { %p3381_p3 = scmp.ne.s32.totalorder %s33_s22, %s3380_s30  ;;  %p3386_p5 = scmp.lt.s32.totalorder %s3380_s30, %s3380_s30 }
   0xd   :  { %p3387_p6 = por %p3386_p5, %p3385_p4 }
   0xf   :  { %p3388_p7 = pnand %p3387_p6, %p3381_p3 }
  0x11   :  { %3391 = shalt.err (!%p3388_p7)
}
  0x12   :  { %s3489_s7 = smov 512   ;;  %s3490_s8 = smov 32  }
  0x13   :  { %38 = dma.hbm_to_vmem [thread:$0]  %s4171_s1, 1024, %s33_s22, [#allocation10], %s3489_s7, %s3489_s7, %s3490_s8  }
  0x14   :  { %s3491_s11 = smov [#allocation6]   ;;  %s3392_s15 = scalar_lea.hbm %s4170_s0, 1024 }
  0x15   :  { %s20_s12 = sshll.u32 %s3491_s11, 4  ;;  %p3393_p8 = scmp.ne.s32.totalorder %s4170_s0, %s3392_s15  ;;  %s21_s12 = int_to_ptr.vmem [resolvable:$true] %s20_s12 }
  0x16   :  { %p3396_p9 = scmp.lt.u32.totalorder %s3392_s15, %s4170_s0 }
  0x18   :  { %p3398_p10 = pnand %p3396_p9, %p3393_p8 }
  0x1a   :  { %3401 = shalt.err (!%p3398_p10)
}
  0x1b   :  { %s3402_s20 = scalar_lea.vmem %s21_s12, 1024  ;;  %p3407_p12 = scmp.lt.s32.totalorder %s21_s12, %s21_s12 }
  0x1c   :  { %p3403_p11 = scmp.ne.s32.totalorder %s21_s12, %s3402_s20  ;;  %p3408_p13 = scmp.lt.s32.totalorder %s3402_s20, %s3402_s20 }
  0x1e   :  { %p3409_p0 = por %p3408_p13, %p3407_p12 }
  0x20   :  { %p3410_p1 = pnand %p3409_p0, %p3403_p11 }
  0x22   :  { %3413 = shalt.err (!%p3410_p1)
}
  0x23   :  { %s3492_s1 = smov 128   ;;  %s3493_s21 = smov 8  }
  0x24   :  { %26 = dma.hbm_to_vmem [thread:$0]  %s4170_s0, 1024, %s21_s12, [#allocation7], %s3492_s1, %s3492_s1, %s3493_s21  }
  0x25   :  { %s3494_s24 = smov [#allocation11]   ;;  %s3495_s26 = smov [#allocation12]  }
  0x26   :  { %s44_s25 = sshll.u32 %s3494_s24, 4  ;;  %s58_s27 = sshll.u32 %s3495_s26, 4  ;;  %s45_s25 = int_to_ptr.vmem [resolvable:$true] %s44_s25  ;;  %s3564_s27 = int_to_ptr.vmem [resolvable:$true] %s58_s27 }
  0x27   :  { %s3414_s30 = scalar_lea.hbm %s4172_s2, 8192 }
  0x28   :  { %p3415_p2 = scmp.ne.s32.totalorder %s4172_s2, %s3414_s30  ;;  %p3418_p3 = scmp.lt.u32.totalorder %s3414_s30, %s4172_s2 }
  0x2a   :  { %p3420_p4 = pnand %p3418_p3, %p3415_p2 }
  0x2c   :  { %3423 = shalt.err (!%p3420_p4)
}
  0x2d   :  { %s3424_s0 = scalar_lea.vmem %s45_s25, 8192  ;;  %p3429_p6 = scmp.lt.s32.totalorder %s45_s25, %s45_s25 }
  0x2e   :  { %p3425_p5 = scmp.ne.s32.totalorder %s45_s25, %s3424_s0  ;;  %p3430_p7 = scmp.lt.s32.totalorder %s3424_s0, %s3424_s0 }
  0x30   :  { %p3431_p8 = por %p3430_p7, %p3429_p6 }
  0x32   :  { %p3432_p9 = pnand %p3431_p8, %p3425_p5 }
  0x34   :  { %3435 = shalt.err (!%p3432_p9)
}
  0x35   :  { %50 = dma.hbm_to_vmem [thread:$0]  %s4172_s2, 8192, %s45_s25, [#allocation10], %s3489_s7, %s3489_s7, %s3490_s8  }
  0x36   :  { %s3436_s17 = scalar_lea.hbm %s4174_s4, 2048 }
  0x37   :  { %p3437_p10 = scmp.ne.s32.totalorder %s4174_s4, %s3436_s17  ;;  %p3440_p11 = scmp.lt.u32.totalorder %s3436_s17, %s4174_s4 }
  0x39   :  { %p3442_p12 = pnand %p3440_p11, %p3437_p10 }
  0x3b   :  { %3445 = shalt.err (!%p3442_p12)
}
  0x3c   :  { %s3446_s23 = scalar_lea.vmem %s3564_s27, 2048  ;;  %p3451_p0 = scmp.lt.s32.totalorder %s3564_s27, %s3564_s27 }
  0x3d   :  { %p3447_p13 = scmp.ne.s32.totalorder %s3564_s27, %s3446_s23  ;;  %p3452_p1 = scmp.lt.s32.totalorder %s3446_s23, %s3446_s23 }
  0x3f   :  { %p3453_p2 = por %p3452_p1, %p3451_p0 }
  0x41   :  { %p3454_p3 = pnand %p3453_p2, %p3447_p13 }
  0x43   :  { %3457 = shalt.err (!%p3454_p3)
}
  0x44   :  { %64 = dma.hbm_to_vmem [thread:$0]  %s4174_s4, 2048, %s3564_s27, [#allocation13], %s3492_s1, %s3492_s1, %s3493_s21  }
  0x45   :  { %3480 = dma.done.wait [#allocation7], 1024  }
  0x46   :  { %3481 = vsyncadd [#allocation7], 4294966272 }
  0x47   :  { %3482 = dma.done.wait [#allocation10], 9216  }
  0x48   :  { %3483 = vsyncadd [#allocation10], 4294958080 }
  0x49   :  { %3484 = dma.done.wait [#allocation13], 2048  }
  0x4a   :  { %3485 = vsyncadd [#allocation13], 4294965248  ;;  %v3496_v0 = vmov 0.0   ;;  %vm148_vm0 = vcmask 1043456   ;;  %vm3497_vm1 = vmmov 1   ;;  %v96_v2 = vld [vmem:[#allocation9 + $0x18] sm:$0xff] }
  0x4b   :  { %338 = vmatprep.mubr.f32.mxu1 %v3496_v0  ;;  %225 = vmatprep.mubr.f32.mxu0 %v3496_v0  ;;  %vm3603_vm2 = vmpackc.low %vm148_vm0, %vm3497_vm1  ;;  %v100_v3 = vld [vmem:[#allocation9 + $0x38] sm:$0xf]  ;;  %v95_v4 = vld [vmem:[#allocation9 + $0x10] sm:$0xff]  ;;  %vm123_vm3 = vcmask 97280  }
  0x4c   :  { %v2617_v5 = vpack.c.bf16 %v100_v3, %v96_v2  ;;  %v99_v6 = vld [vmem:[#allocation9 + $0x30] sm:$0xf]  ;;  %v426_v7 = vld [vmem:[#allocation11 + $0x8] sm:$0xff]  ;;  %v425_v10 = vld [vmem:[#allocation11] sm:$0xff] }
  0x4d   :  { %v2620_v8 = vpack.c.bf16 %v99_v6, %v95_v4  ;;  %v430_v9 = vld [vmem:[#allocation11 + $0x28] sm:$0xff]  ;;  %v429_v11 = vld [vmem:[#allocation11 + $0x20] sm:$0xff]  ;;  %v3632_v29 = vld [vmem:[#allocation6 + $0x10] sm:$0xff] }
  0x4e   :  { %2619 = vmatprep.subr.msk.bf16.mxu1 %vm3603_vm2, %v2617_v5  ;;  %v3609_v12 = vpack.c.bf16 %v430_v9, %v426_v7  ;;  %v434_v13 = vld [vmem:[#allocation11 + $0x48] sm:$0xff]  ;;  %v85_v15 = vld [vmem:[#allocation6] sm:$0xff]  ;;  %v3613_v16 = vpack.c.bf16 %v429_v11, %v425_v10  ;;  %v3643_v42 = vld [vmem:[#allocation6 + $0x18] sm:$0xff] }
  0x4f   :  { %v438_v14 = vld [vmem:[#allocation11 + $0x68] sm:$0xff]  ;;  %2622 = vmatpush1.bf16.msk.msra.mxu1 %vm3603_vm2, %v2620_v8  ;;  %v433_v18 = vld [vmem:[#allocation11 + $0x40] sm:$0xff]  ;;  %v91_v63 = vld [vmem:[#allocation6 + $0x30] sm:$0xff] }
  0x50   :  { %2624 = vmatprep.subr.bf16.mxu1 %v3609_v12  ;;  %v3616_v17 = vpack.c.bf16 %v438_v14, %v434_v13  ;;  %v437_v19 = vld [vmem:[#allocation11 + $0x60] sm:$0xff]  ;;  %v442_v20 = vld [vmem:[#allocation11 + $0x88] sm:$0xff]  ;;  %v428_v5 = vld [vmem:[#allocation11 + $0x18] sm:$0xff] }
  0x51   :  { %v446_v21 = vld [vmem:[#allocation11 + $0xa8] sm:$0xff]  ;;  %v3623_v23 = vpack.c.bf16 %v437_v19, %v433_v18  ;;  %v441_v25 = vld [vmem:[#allocation11 + $0x80] sm:$0xff]  ;;  %v432_v6 = vld [vmem:[#allocation11 + $0x38] sm:$0xff] }
  0x52   :  { %2510 = vmatmul.mubr.msk.f32.vlgmr.msra.gmra.mrb[0].mxu1 %vm123_vm3, %v85_v15  ;;  %v3621_v22 = vld [vmem:[#allocation6 + $0x8] sm:$0xff]  ;;  %v3626_v24 = vpack.c.bf16 %v446_v21, %v442_v20  ;;  %v445_v26 = vld [vmem:[#allocation11 + $0xa0] sm:$0xff]  ;;  %v92_v7 = vld [vmem:[#allocation6 + $0x38] sm:$0xff]  ;;  %v3706_v9 = vpack.c.bf16 %v432_v6, %v428_v5  ;;  %v103_v6 = vlaneseq }
  0x53   :  { %2626 = vmatpush1.bf16.msra.mxu1 %v3613_v16  ;;  %344 = vmatprep.mubr.f32.mxu1 %v3496_v0  ;;  %v450_v27 = vld [vmem:[#allocation11 + $0xc8] sm:$0xff]  ;;  %v3634_v30 = vpack.c.bf16 %v445_v26, %v441_v25  ;;  %v449_v31 = vld [vmem:[#allocation11 + $0xc0] sm:$0xff]  ;;  %v427_v10 = vld [vmem:[#allocation11 + $0x10] sm:$0xff] }
  0x54   :  { %2628 = vmatprep.subr.bf16.mxu1 %v3616_v17  ;;  %v454_v28 = vld [vmem:[#allocation11 + $0xe8] sm:$0xff]  ;;  %v453_v32 = vld [vmem:[#allocation11 + $0xe0] sm:$0xff]  ;;  %v431_v11 = vld [vmem:[#allocation11 + $0x30] sm:$0xff] }
  0x55   :  { %v3637_v33 = vpack.c.bf16 %v454_v28, %v450_v27  ;;  %v94_v34 = vld [vmem:[#allocation9 + $0x8] sm:$0xff]  ;;  %v93_v36 = vld [vmem:[#allocation9] sm:$0xff]  ;;  %v3645_v43 = vpack.c.bf16 %v453_v32, %v449_v31  ;;  %v436_v13 = vld [vmem:[#allocation11 + $0x58] sm:$0xff] }
  0x56   :  { %2511 = vmatmul.mubr.msk.f32.gmra.mrb[2].mxu1 %vm123_vm3, %v3621_v22  ;;  %v98_v35 = vld [vmem:[#allocation9 + $0x28] sm:$0xf]  ;;  %v97_v40 = vld [vmem:[#allocation9 + $0x20] sm:$0xf]  ;;  %v440_v14 = vld [vmem:[#allocation11 + $0x78] sm:$0xff] }
  0x57   :  { %2630 = vmatpush1.bf16.msra.mxu1 %v3623_v23  ;;  %350 = vmatprep.mubr.f32.mxu1 %v3496_v0  ;;  %v458_v37 = vld [vmem:[#allocation11 + $0x108] sm:$0xff]  ;;  %v2611_v39 = vpack.c.bf16 %v98_v35, %v94_v34  ;;  %v2614_v41 = vpack.c.bf16 %v97_v40, %v93_v36  ;;  %v457_v45 = vld [vmem:[#allocation11 + $0x100] sm:$0xff]  ;;  %v3719_v18 = vpack.c.bf16 %v440_v14, %v436_v13  ;;  %v435_v19 = vld [vmem:[#allocation11 + $0x50] sm:$0xff] }
  0x58   :  { %2632 = vmatprep.subr.bf16.mxu1 %v3626_v24  ;;  %v462_v38 = vld [vmem:[#allocation11 + $0x128] sm:$0xff]  ;;  %v461_v46 = vld [vmem:[#allocation11 + $0x120] sm:$0xff]  ;;  %v439_v20 = vld [vmem:[#allocation11 + $0x70] sm:$0xff] }
  0x59   :  { %v3648_v44 = vpack.c.bf16 %v462_v38, %v458_v37  ;;  %2613 = vmatprep.subr.msk.bf16.mxu0 %vm3603_vm2, %v2611_v39  ;;  %v466_v47 = vld [vmem:[#allocation11 + $0x148] sm:$0xff]  ;;  %v3659_v49 = vld [vmem:[#allocation6 + $0x20] sm:$0xff]  ;;  %v3661_v50 = vpack.c.bf16 %v461_v46, %v457_v45  ;;  %v444_v21 = vld [vmem:[#allocation11 + $0x98] sm:$0xff]  ;;  %v3728_v25 = vpack.c.bf16 %v439_v20, %v435_v19 }
  0x5a   :  { %2512 = vmatmul.mubr.msk.f32.gmra.mrb[4].mxu1 %vm123_vm3, %v3632_v29  ;;  %v470_v48 = vld [vmem:[#allocation11 + $0x168] sm:$0xff]  ;;  %2616 = vmatpush1.bf16.msk.msra.mxu0 %vm3603_vm2, %v2614_v41  ;;  %v465_v52 = vld [vmem:[#allocation11 + $0x140] sm:$0xff]  ;;  %v443_v27 = vld [vmem:[#allocation11 + $0x90] sm:$0xff] }
  0x5b   :  { %2634 = vmatpush1.bf16.msra.mxu1 %v3634_v30  ;;  %356 = vmatprep.mubr.f32.mxu1 %v3496_v0  ;;  %v3664_v51 = vpack.c.bf16 %v470_v48, %v466_v47  ;;  %v469_v53 = vld [vmem:[#allocation11 + $0x160] sm:$0xff]  ;;  %v474_v54 = vld [vmem:[#allocation11 + $0x188] sm:$0xff]  ;;  %v447_v28 = vld [vmem:[#allocation11 + $0xb0] sm:$0xff] }
  0x5c   :  { %2636 = vmatprep.subr.bf16.mxu1 %v3637_v33  ;;  %2688 = vmatprep.subr.bf16.mxu0 %v3609_v12  ;;  %v478_v55 = vld [vmem:[#allocation11 + $0x1a8] sm:$0xff]  ;;  %v3676_v57 = vpack.c.bf16 %v469_v53, %v465_v52  ;;  %v473_v59 = vld [vmem:[#allocation11 + $0x180] sm:$0xff]  ;;  %v456_v31 = vld [vmem:[#allocation11 + $0xf8] sm:$0xff]  ;;  %v3740_v32 = vpack.c.bf16 %v447_v28, %v443_v27 }
  0x5d   :  { %2500 = vmatmul.mubr.msk.f32.vlgmr.msra.gmra.mrb[0].mxu0 %vm123_vm3, %v85_v15  ;;  %v3674_v56 = vld [vmem:[#allocation6 + $0x28] sm:$0xff]  ;;  %v3679_v58 = vpack.c.bf16 %v478_v55, %v474_v54  ;;  %v477_v60 = vld [vmem:[#allocation11 + $0x1a0] sm:$0xff]  ;;  %v3716_v15 = vpack.c.bf16 %v431_v11, %v427_v10  ;;  %v451_v35 = vld [vmem:[#allocation11 + $0xd0] sm:$0xff]  ;;  %v104_v11 = vshrl.u32 %v103_v6, 7 }
  0x5e   :  { %2513 = vmatmul.mubr.msk.f32.gmra.mrb[6].mxu1 %vm123_vm3, %v3643_v42  ;;  %2690 = vmatpush1.bf16.msra.mxu0 %v3613_v16  ;;  %v482_v61 = vld [vmem:[#allocation11 + $0x1c8] sm:$0xff]  ;;  %v3690_v1 = vpack.c.bf16 %v477_v60, %v473_v59  ;;  %v481_v3 = vld [vmem:[#allocation11 + $0x1c0] sm:$0xff]  ;;  %v455_v36 = vld [vmem:[#allocation11 + $0xf0] sm:$0xff] }
  0x5f   :  { %2638 = vmatpush1.bf16.msra.mxu1 %v3645_v43  ;;  %362 = vmatprep.mubr.f32.mxu1 %v3496_v0  ;;  %v486_v62 = vld [vmem:[#allocation11 + $0x1e8] sm:$0xff]  ;;  %v485_v4 = vld [vmem:[#allocation11 + $0x1e0] sm:$0xff]  ;;  %v460_v37 = vld [vmem:[#allocation11 + $0x118] sm:$0xff]  ;;  %v3750_v39 = vpack.c.bf16 %v455_v36, %v451_v35  ;;  %v105_v13 = vsub.s32 0, %v104_v11  ;;  %v109_v19 = vsub.s32 1, %v104_v11 }
  0x60   :  { %2640 = vmatprep.subr.bf16.mxu1 %v3648_v44  ;;  %231 = vmatprep.mubr.f32.mxu0 %v3496_v0  ;;  %v3693_v2 = vpack.c.bf16 %v486_v62, %v482_v61  ;;  %v3703_v8 = vpack.c.bf16 %v485_v4, %v481_v3  ;;  %v464_v38 = vld [vmem:[#allocation11 + $0x138] sm:$0xff]  ;;  %v459_v41 = vld [vmem:[#allocation11 + $0x110] sm:$0xff]  ;;  %v101_v14 = vld [vmem:[%s4173_s3] sm:$0xf] }
  0x61   :  { %2692 = vmatprep.subr.bf16.mxu0 %v3616_v17  ;;  %2501 = vmatmul.mubr.msk.f32.gmra.mrb[2].mxu0 %vm123_vm3, %v3621_v22  ;;  %v448_v22 = vld [vmem:[#allocation11 + $0xb8] sm:$0xff]  ;;  %v3753_v40 = vpack.c.bf16 %v464_v38, %v460_v37  ;;  %v471_v52 = vld [vmem:[#allocation11 + $0x170] sm:$0xff]  ;;  %v3804_v20 = vrot.slane %v101_v14, %v105_v13  ;;  %v113_v38 = vsub.s32 2, %v104_v11 }
  0x62   :  { %2514 = vmatmul.mubr.msk.f32.gmra.mrb[8].mxu1 %vm123_vm3, %v3659_v49  ;;  %2694 = vmatpush1.bf16.msra.mxu0 %v3623_v23  ;;  %v3732_v26 = vpack.c.bf16 %v448_v22, %v444_v21  ;;  %v468_v45 = vld [vmem:[#allocation11 + $0x158] sm:$0xff]  ;;  %v479_v59 = vld [vmem:[#allocation11 + $0x1b0] sm:$0xff]  ;;  %v3806_v21 = vrot.slane %v101_v14, %v109_v19 }
  0x63   :  { %2642 = vmatpush1.bf16.msra.mxu1 %v3661_v50  ;;  %368 = vmatprep.mubr.f32.mxu1 %v3496_v0  ;;  %v472_v46 = vld [vmem:[#allocation11 + $0x178] sm:$0xff]  ;;  %v483_v3 = vld [vmem:[#allocation11 + $0x1d0] sm:$0xff] }
  0x64   :  { %2644 = vmatprep.subr.bf16.mxu1 %v3664_v51  ;;  %237 = vmatprep.mubr.f32.mxu0 %v3496_v0  ;;  %v3763_v48 = vpack.c.bf16 %v472_v46, %v468_v45  ;;  %v476_v53 = vld [vmem:[#allocation11 + $0x198] sm:$0xff]  ;;  %v487_v4 = vld [vmem:[#allocation11 + $0x1f0] sm:$0xff]  ;;  %v3810_v46 = vrot.slane %v101_v14, %v113_v38 }
  0x65   :  { %2696 = vmatprep.subr.bf16.mxu0 %v3626_v24  ;;  %2502 = vmatmul.mubr.msk.f32.gmra.mrb[4].mxu0 %vm123_vm3, %v3632_v29  ;;  %v452_v29 = vld [vmem:[#allocation11 + $0xd8] sm:$0xff]  ;;  %v3778_v5 = vpack.c.bf16 %v487_v4, %v483_v3 }
  0x66   :  { %2515 = vmatmul.mubr.msk.f32.gmra.mrb[10].mxu1 %vm123_vm3, %v3674_v56  ;;  %2698 = vmatpush1.bf16.msra.mxu0 %v3634_v30  ;;  %v3743_v34 = vpack.c.bf16 %v456_v31, %v452_v29  ;;  %v480_v54 = vld [vmem:[#allocation11 + $0x1b8] sm:$0xff] }
  0x67   :  { %2646 = vmatpush1.bf16.msra.mxu1 %v3676_v57  ;;  %374 = vmatprep.mubr.f32.mxu1 %v3496_v0  ;;  %v484_v60 = vld [vmem:[#allocation11 + $0x1d8] sm:$0xff] }
  0x68   :  { %2648 = vmatprep.subr.bf16.mxu1 %v3679_v58  ;;  %243 = vmatprep.mubr.f32.mxu0 %v3496_v0  ;;  %v488_v61 = vld [vmem:[#allocation11 + $0x1f8] sm:$0xff] }
  0x69   :  { %2700 = vmatprep.subr.bf16.mxu0 %v3637_v33  ;;  %2503 = vmatmul.mubr.msk.f32.gmra.mrb[6].mxu0 %vm123_vm3, %v3643_v42  ;;  %v463_v42 = vld [vmem:[#allocation11 + $0x130] sm:$0xff] }
  0x6a   :  { %2516 = vmatmul.mubr.msk.f32.gmra.mrb[12].mxu1 %vm123_vm3, %v91_v63  ;;  %2702 = vmatpush1.bf16.msra.mxu0 %v3645_v43  ;;  %v3760_v47 = vpack.c.bf16 %v463_v42, %v459_v41  ;;  %v117_v41 = vsub.s32 3, %v104_v11 }
  0x6b   :  { %2650 = vmatpush1.bf16.msra.mxu1 %v3690_v1  ;;  %380 = vmatprep.mubr.f32.mxu1 %v3496_v0 }
  0x6c   :  { %2652 = vmatprep.subr.bf16.mxu1 %v3693_v2  ;;  %249 = vmatprep.mubr.f32.mxu0 %v3496_v0 }
  0x6d   :  { %2704 = vmatprep.subr.bf16.mxu0 %v3648_v44  ;;  %2504 = vmatmul.mubr.msk.f32.gmra.mrb[8].mxu0 %vm123_vm3, %v3659_v49  ;;  %v467_v49 = vld [vmem:[#allocation11 + $0x150] sm:$0xff] }
  0x6e   :  { %2517 = vmatmul.mubr.msk.f32.gmra.mrb[14].mxu1 %vm123_vm3, %v92_v7  ;;  %2706 = vmatpush1.bf16.msra.mxu0 %v3661_v50  ;;  %v3766_v55 = vpack.c.bf16 %v471_v52, %v467_v49  ;;  %v3812_v52 = vrot.slane %v101_v14, %v117_v41 }
  0x6f   :  { %2654 = vmatpush1.bf16.msra.mxu1 %v3703_v8  ;;  %553 = vmatprep.mubr.f32.mxu1 %v3496_v0 }
  0x70   :  { %2656 = vmatprep.subr.bf16.mxu1 %v3706_v9  ;;  %255 = vmatprep.mubr.f32.mxu0 %v3496_v0 }
  0x71   :  { %2708 = vmatprep.subr.bf16.mxu0 %v3664_v51  ;;  %2505 = vmatmul.mubr.msk.f32.gmra.mrb[10].mxu0 %vm123_vm3, %v3674_v56  ;;  %v3769_v56 = vpack.c.bf16 %v480_v54, %v476_v53 }
  0x72   :  { %554 = vmatmul.mubr.f32.vlgmr.msra.gmra.mrb[16].mxu1 %v3496_v0  ;;  %2710 = vmatpush1.bf16.msra.mxu0 %v3676_v57 }
  0x73   :  { %2658 = vmatpush1.bf16.msra.mxu1 %v3716_v15  ;;  %624 = vmatprep.mubr.f32.mxu1 %v3496_v0 }
  0x74   :  { %2660 = vmatprep.subr.bf16.mxu1 %v3719_v18  ;;  %261 = vmatprep.mubr.f32.mxu0 %v3496_v0 }
  0x75   :  { %2712 = vmatprep.subr.bf16.mxu0 %v3679_v58  ;;  %2506 = vmatmul.mubr.msk.f32.gmra.mrb[12].mxu0 %vm123_vm3, %v91_v63  ;;  %v3775_v63 = vpack.c.bf16 %v488_v61, %v484_v60 }
  0x76   :  { %2714 = vmatpush1.bf16.msra.mxu0 %v3690_v1  ;;  %267 = vmatprep.mubr.f32.mxu0 %v3496_v0 }
  0x77   :  { %2662 = vmatpush1.bf16.msra.mxu1 %v3728_v25  ;;  %2716 = vmatprep.subr.bf16.mxu0 %v3693_v2 }
  0x78   :  { %2664 = vmatprep.subr.bf16.mxu1 %v3732_v26 }
  0x79   :  { %2507 = vmatmul.mubr.msk.f32.gmra.mrb[14].mxu0 %vm123_vm3, %v92_v7 }
  0x7a   :  { %2718 = vmatpush1.bf16.msra.mxu0 %v3703_v8  ;;  %792 = vmatprep.mubr.f32.mxu0 %v3496_v0 }
  0x7b   :  { %2666 = vmatpush1.bf16.msra.mxu1 %v3740_v32  ;;  %2752 = vmatprep.subr.bf16.mxu0 %v3609_v12  ;;  %v475_v12 = vld [vmem:[#allocation11 + $0x190] sm:$0xff] }
  0x7c   :  { %2668 = vmatprep.subr.bf16.mxu1 %v3743_v34  ;;  %v3772_v62 = vpack.c.bf16 %v479_v59, %v475_v12 }
  0x7f   :  { %2670 = vmatpush1.bf16.msra.mxu1 %v3750_v39 }
  0x80   :  { %2672 = vmatprep.subr.bf16.mxu1 %v3753_v40 }
  0x83   :  { %2674 = vmatpush1.bf16.msra.mxu1 %v3760_v47 }
  0x84   :  { %2676 = vmatprep.subr.bf16.mxu1 %v3763_v48 }
  0x87   :  { %2678 = vmatpush1.bf16.msra.mxu1 %v3766_v55 }
  0x88   :  { %2680 = vmatprep.subr.bf16.mxu1 %v3769_v56 }
  0x8b   :  { %2682 = vmatpush1.bf16.msra.mxu1 %v3772_v62 }
  0x8c   :  { %2684 = vmatprep.subr.bf16.mxu1 %v3775_v63 }
  0x8f   :  { %2686 = vmatpush1.bf16.msra.mxu1 %v3778_v5 }
  0x90   :  { %2720 = vmatprep.subr.bf16.mxu1 %v3706_v9 }
  0x92   :  { %625 = vmatmul.mubr.f32.vlgmr.msra.gmra.mrb[0].mxu1 %v3496_v0 }
  0x93   :  { %2722 = vmatpush1.bf16.msra.mxu1 %v3716_v15  ;;  %863 = vmatprep.mubr.f32.mxu1 %v3496_v0 }
  0x94   :  { %2724 = vmatprep.subr.bf16.mxu1 %v3719_v18 }
  0x97   :  { %2726 = vmatpush1.bf16.msra.mxu1 %v3728_v25 }
  0x98   :  { %2728 = vmatprep.subr.bf16.mxu1 %v3732_v26 }
  0x9b   :  { %2730 = vmatpush1.bf16.msra.mxu1 %v3740_v32 }
  0x9c   :  { %2732 = vmatprep.subr.bf16.mxu1 %v3743_v34 }
  0x9f   :  { %2734 = vmatpush1.bf16.msra.mxu1 %v3750_v39 }
  0xa0   :  { %2736 = vmatprep.subr.bf16.mxu1 %v3753_v40 }
  0xa3   :  { %2738 = vmatpush1.bf16.msra.mxu1 %v3760_v47 }
  0xa4   :  { %2740 = vmatprep.subr.bf16.mxu1 %v3763_v48 }
  0xa7   :  { %2742 = vmatpush1.bf16.msra.mxu1 %v3766_v55 }
  0xa8   :  { %2744 = vmatprep.subr.bf16.mxu1 %v3769_v56 }
  0xab   :  { %2746 = vmatpush1.bf16.msra.mxu1 %v3772_v62 }
  0xac   :  { %2748 = vmatprep.subr.bf16.mxu1 %v3775_v63 }
  0xaf   :  { %2750 = vmatpush1.bf16.msra.mxu1 %v3778_v5 }
  0xb0   :  { %2784 = vmatprep.subr.bf16.mxu1 %v3706_v9 }
 0x130   :  { %v227_v7 = vpop.f32.mrb[0].mxu0 }
 0x131   :  { %v229_v10 = vpop.f32.mrb[1].mxu0  ;;  %v228_v22 = vadd.f32 %v227_v7, %v3804_v20 }
 0x132   :  { %v230_v27 = vadd.f32 %v229_v10, %v3806_v21 }
 0x145   :  { %v555_v28 = vpop.f32.mrb[16].mxu1 }
 0x146   :  { %v631_v29 = vadd.f32 %v555_v28, %v228_v22  ;;  %v557_v31 = vpop.f32.mrb[17].mxu1 }
 0x147   :  { %v632_v35 = vadd.f32 %v557_v31, %v230_v27 }
 0x148   :  { %v2518_v37 = vmul.f32 -1.442695, %v631_v29 }
 0x149   :  { %v2519_v36 = vmul.f32 -1.442695, %v632_v35 }
 0x14b   :  { %3242 = vpow2.f32 %v2519_v36 }
 0x14c   :  { %3244 = vpow2.f32 %v2518_v37 }
 0x155   :  { %v3243_v42 = vpop.eup %3242 }
 0x156   :  { %v3245_v45 = vpop.eup %3244  ;;  %v645_v49 = vadd.f32 1.0, %v3243_v42 }
 0x157   :  { %v644_v53 = vadd.f32 1.0, %v3245_v45 }
 0x158   :  { %3246 = vrcp.f32 %v645_v49  ;;  %v1158_v49 = vld [vmem:[#allocation11 + $0x80] sm:$0xff] }
 0x159   :  { %3248 = vrcp.f32 %v644_v53  ;;  %v1162_v53 = vld [vmem:[#allocation11 + $0xa0] sm:$0xff] }
 0x162   :  { %v3247_v3 = vpop.eup %3246 }
 0x163   :  { %v3249_v4 = vpop.eup %3248  ;;  %v654_v10 = vmul.f32 0.0, %v3247_v3  ;;  %v1170_v3 = vld [vmem:[#allocation11 + $0xe0] sm:$0xff] }
 0x165   :  { %v626_v54 = vpop.f32.mrb[0].mxu1 }
 0x166   :  { %v3185_v12 = vadd.f32 %v626_v54, %v3810_v46  ;;  %v628_v59 = vpop.f32.mrb[1].mxu1  ;;  %v3899_v54 = vpack.c.bf16 %v1162_v53, %v1158_v49 }
 0x167   :  { %v3186_v60 = vadd.f32 %v628_v59, %v3812_v52  ;;  %v1171_v59 = vld [vmem:[#allocation11 + $0xe8] sm:$0xff] }
 0x168   :  { %v2520_v61 = vmul.f32 -1.442695, %v3185_v12  ;;  %v1167_v12 = vld [vmem:[#allocation11 + $0xc8] sm:$0xff] }
 0x169   :  { %3250 = vtanh.f32 %v3186_v60  ;;  %v3903_v60 = vpack.c.bf16 %v1171_v59, %v1167_v12 }
 0x16a   :  { %3252 = vpow2.f32 %v2520_v61  ;;  %v1166_v61 = vld [vmem:[#allocation11 + $0xc0] sm:$0xff] }
 0x173   :  { %v3251_v6 = vpop.eup %3250 }
 0x174   :  { %v3253_v7 = vpop.eup %3252  ;;  %v655_v11 = vmul.f32 %v3251_v6, %v3249_v4  ;;  %v3905_v4 = vpack.c.bf16 %v1170_v3, %v1166_v61  ;;  %v1175_v6 = vld [vmem:[#allocation11 + $0x108] sm:$0xff] }
 0x175   :  { %v646_v13 = vadd.f32 1.0, %v3253_v7  ;;  %v1179_v7 = vld [vmem:[#allocation11 + $0x128] sm:$0xff] }
 0x176   :  { %v3816_v14 = vadd.f32 %v655_v11, %v654_v10  ;;  %v3909_v10 = vpack.c.bf16 %v1179_v7, %v1175_v6  ;;  %v1174_v11 = vld [vmem:[#allocation11 + $0x100] sm:$0xff] }
 0x177   :  { %3254 = vrcp.f32 %v646_v13  ;;  %v1178_v13 = vld [vmem:[#allocation11 + $0x120] sm:$0xff] }
 0x178   :  { %3256 = vtanh.f32 %v3816_v14 }
 0x181   :  { %v3255_v19 = vpop.eup %3254 }
 0x182   :  { %v3257_v22 = vpop.eup %3256 }
 0x183   :  { %v3819_v27 = vmul.f32 %v3257_v22, %v3255_v19  ;;  %v1183_v19 = vld [vmem:[#allocation11 + $0x148] sm:$0xff] }
 0x184   :  { %v1187_v22 = vld [vmem:[#allocation11 + $0x168] sm:$0xff] }
 0x185   :  { %793 = vmatmul.mubr.f32.vlgmr.msra.gmra.mrb[2].mxu0 %v3819_v27  ;;  %864 = vmatmul.mubr.f32.vlgmr.msra.gmra.mrb[2].mxu1 %v3819_v27 }
 0x186   :  { %2754 = vmatpush1.bf16.msra.mxu0 %v3613_v16  ;;  %2786 = vmatpush1.bf16.msra.mxu1 %v3716_v15 }
 0x187   :  { %2756 = vmatprep.subr.bf16.mxu0 %v3616_v17  ;;  %2788 = vmatprep.subr.bf16.mxu1 %v3719_v18 }
 0x188   :  { %1031 = vmatprep.mubr.f32.mxu0 %v3496_v0  ;;  %1102 = vmatprep.mubr.f32.mxu1 %v3496_v0 }
 0x18a   :  { %2758 = vmatpush1.bf16.msra.mxu0 %v3623_v23  ;;  %2790 = vmatpush1.bf16.msra.mxu1 %v3728_v25 }
 0x18b   :  { %2760 = vmatprep.subr.bf16.mxu0 %v3626_v24  ;;  %2792 = vmatprep.subr.bf16.mxu1 %v3732_v26 }
 0x18e   :  { %2762 = vmatpush1.bf16.msra.mxu0 %v3634_v30  ;;  %2794 = vmatpush1.bf16.msra.mxu1 %v3740_v32 }
 0x18f   :  { %2764 = vmatprep.subr.bf16.mxu0 %v3637_v33  ;;  %2796 = vmatprep.subr.bf16.mxu1 %v3743_v34 }
 0x192   :  { %2766 = vmatpush1.bf16.msra.mxu0 %v3645_v43  ;;  %2798 = vmatpush1.bf16.msra.mxu1 %v3750_v39 }
 0x193   :  { %2768 = vmatprep.subr.bf16.mxu0 %v3648_v44  ;;  %2800 = vmatprep.subr.bf16.mxu1 %v3753_v40 }
 0x196   :  { %2770 = vmatpush1.bf16.msra.mxu0 %v3661_v50  ;;  %2802 = vmatpush1.bf16.msra.mxu1 %v3760_v47 }
 0x197   :  { %2772 = vmatprep.subr.bf16.mxu0 %v3664_v51  ;;  %2804 = vmatprep.subr.bf16.mxu1 %v3763_v48 }
 0x19a   :  { %2774 = vmatpush1.bf16.msra.mxu0 %v3676_v57  ;;  %2806 = vmatpush1.bf16.msra.mxu1 %v3766_v55 }
 0x19b   :  { %2776 = vmatprep.subr.bf16.mxu0 %v3679_v58  ;;  %2808 = vmatprep.subr.bf16.mxu1 %v3769_v56 }
 0x19e   :  { %2778 = vmatpush1.bf16.msra.mxu0 %v3690_v1  ;;  %2810 = vmatpush1.bf16.msra.mxu1 %v3772_v62 }
 0x19f   :  { %2780 = vmatprep.subr.bf16.mxu0 %v3693_v2  ;;  %2812 = vmatprep.subr.bf16.mxu1 %v3775_v63 }
 0x1a2   :  { %2782 = vmatpush1.bf16.msra.mxu0 %v3703_v8  ;;  %2814 = vmatpush1.bf16.msra.mxu1 %v3778_v5 }
 0x1a3   :  { %2848 = vmatprep.subr.bf16.mxu1 %v3706_v9 }
 0x258   :  { %v794_v16 = vpop.f32.mrb[2].mxu0  ;;  %v865_v17 = vpop.f32.mrb[2].mxu1 }
 0x259   :  { %v3171_v23 = vadd.f32 %v794_v16, %v3804_v20  ;;  %v796_v24 = vpop.f32.mrb[3].mxu0  ;;  %v867_v30 = vpop.f32.mrb[3].mxu1  ;;  %v3187_v50 = vadd.f32 %v865_v17, %v3810_v46  ;;  %v3915_v16 = vpack.c.bf16 %v1187_v22, %v1183_v19  ;;  %v1182_v17 = vld [vmem:[#allocation11 + $0x140] sm:$0xff]  ;;  %v1383_v19 = vld [vmem:[#allocation11 + $0x10] sm:$0xff] }
 0x25a   :  { %v3172_v33 = vadd.f32 %v796_v24, %v3806_v21  ;;  %v3188_v51 = vadd.f32 %v867_v30, %v3812_v52  ;;  %v1191_v30 = vld [vmem:[#allocation11 + $0x188] sm:$0xff]  ;;  %v1387_v22 = vld [vmem:[#allocation11 + $0x30] sm:$0xff] }
 0x25b   :  { %v2521_v43 = vmul.f32 -1.442695, %v3171_v23  ;;  %v2523_v57 = vmul.f32 -1.442695, %v3187_v50  ;;  %v1186_v23 = vld [vmem:[#allocation11 + $0x160] sm:$0xff] }
 0x25c   :  { %v2522_v44 = vmul.f32 -1.442695, %v3172_v33  ;;  %v3917_v24 = vpack.c.bf16 %v1186_v23, %v1182_v17  ;;  %v1195_v33 = vld [vmem:[#allocation11 + $0x1a8] sm:$0xff]  ;;  %v1194_v50 = vld [vmem:[#allocation11 + $0x1a0] sm:$0xff]  ;;  %v3966_v17 = vpack.c.bf16 %v1387_v22, %v1383_v19  ;;  %v1392_v23 = vld [vmem:[#allocation11 + $0x58] sm:$0xff] }
 0x25d   :  { %3258 = vpow2.f32 %v2521_v43  ;;  %v1190_v43 = vld [vmem:[#allocation11 + $0x180] sm:$0xff]  ;;  %v1440_v19 = vld [vmem:[#allocation11 + $0x1d8] sm:$0xff] }
 0x25e   :  { %3260 = vpow2.f32 %v2522_v44  ;;  %v3920_v44 = vpack.c.bf16 %v1195_v33, %v1191_v30  ;;  %v1396_v30 = vld [vmem:[#allocation11 + $0x78] sm:$0xff] }
 0x25f   :  { %3262 = vtanh.f32 %v3188_v51  ;;  %v1199_v51 = vld [vmem:[#allocation11 + $0x1c8] sm:$0xff]  ;;  %v3970_v33 = vpack.c.bf16 %v1396_v30, %v1392_v23  ;;  %v1444_v22 = vld [vmem:[#allocation11 + $0x1f8] sm:$0xff] }
 0x260   :  { %3264 = vpow2.f32 %v2523_v57  ;;  %v1203_v57 = vld [vmem:[#allocation11 + $0x1e8] sm:$0xff]  ;;  %v4005_v30 = vpack.c.bf16 %v1444_v22, %v1440_v19 }
 0x267   :  { %v3259_v58 = vpop.eup %3258 }
 0x268   :  { %v883_v1 = vadd.f32 1.0, %v3259_v58  ;;  %v3261_v2 = vpop.eup %3260  ;;  %v3923_v58 = vpack.c.bf16 %v1194_v50, %v1190_v43  ;;  %v1391_v43 = vld [vmem:[#allocation11 + $0x50] sm:$0xff] }
 0x269   :  { %v884_v8 = vadd.f32 1.0, %v3261_v2  ;;  %v3263_v9 = vpop.eup %3262  ;;  %v1198_v2 = vld [vmem:[#allocation11 + $0x1c0] sm:$0xff]  ;;  %v1395_v50 = vld [vmem:[#allocation11 + $0x70] sm:$0xff] }
 0x26a   :  { %3266 = vrcp.f32 %v883_v1  ;;  %v3265_v28 = vpop.eup %3264  ;;  %v3926_v1 = vpack.c.bf16 %v1203_v57, %v1199_v51  ;;  %v3972_v51 = vpack.c.bf16 %v1395_v50, %v1391_v43  ;;  %v1400_v57 = vld [vmem:[#allocation11 + $0x98] sm:$0xff]  ;;  %v1439_v43 = vld [vmem:[#allocation11 + $0x1d0] sm:$0xff] }
 0x26b   :  { %3268 = vrcp.f32 %v884_v8  ;;  %v885_v36 = vadd.f32 1.0, %v3265_v28  ;;  %v1202_v8 = vld [vmem:[#allocation11 + $0x1e0] sm:$0xff]  ;;  %v1443_v50 = vld [vmem:[#allocation11 + $0x1f0] sm:$0xff] }
 0x26d   :  { %3270 = vrcp.f32 %v885_v36 }
 0x274   :  { %v3267_v29 = vpop.eup %3266 }
 0x275   :  { %v894_v31 = vmul.f32 %v3267_v29, %v3263_v9  ;;  %v3269_v35 = vpop.eup %3268  ;;  %v3929_v9 = vpack.c.bf16 %v1202_v8, %v1198_v2  ;;  %v1404_v2 = vld [vmem:[#allocation11 + $0xb8] sm:$0xff] }
 0x276   :  { %v893_v37 = vmul.f32 %v3269_v35, %v3816_v14  ;;  %v3911_v14 = vpack.c.bf16 %v1178_v13, %v1174_v11  ;;  %v1388_v11 = vld [vmem:[#allocation11 + $0x38] sm:$0xff]  ;;  %v3976_v8 = vpack.c.bf16 %v1404_v2, %v1400_v57  ;;  %v4008_v57 = vpack.c.bf16 %v1443_v50, %v1439_v43 }
 0x277   :  { %v3271_v41 = vpop.eup %3270 }
 0x278   :  { %v3861_v38 = vadd.f32 %v894_v31, %v893_v37 }
 0x27a   :  { %3272 = vtanh.f32 %v3861_v38 }
 0x284   :  { %v3273_v42 = vpop.eup %3272 }
 0x285   :  { %v3864_v45 = vmul.f32 %v3273_v42, %v3271_v41 }
 0x287   :  { %1032 = vmatmul.mubr.f32.vlgmr.msra.gmra.mrb[4].mxu0 %v3864_v45  ;;  %1103 = vmatmul.mubr.f32.vlgmr.msra.gmra.mrb[4].mxu1 %v3864_v45 }
 0x288   :  { %2850 = vmatpush1.bf16.msra.mxu1 %v3716_v15  ;;  %1270 = vmatprep.mubr.f32.mxu0 %v3496_v0  ;;  %v1143_v15 = vld [vmem:[#allocation11 + $0x8] sm:$0xff] }
 0x289   :  { %2852 = vmatprep.subr.bf16.mxu1 %v3719_v18  ;;  %1341 = vmatprep.mubr.f32.mxu1 %v3496_v0  ;;  %v1147_v18 = vld [vmem:[#allocation11 + $0x28] sm:$0xff] }
 0x28c   :  { %2854 = vmatpush1.bf16.msra.mxu1 %v3728_v25  ;;  %v3885_v25 = vpack.c.bf16 %v1147_v18, %v1143_v15 }
 0x28d   :  { %2856 = vmatprep.subr.bf16.mxu1 %v3732_v26  ;;  %v1142_v26 = vld [vmem:[#allocation11] sm:$0xff] }
 0x28e   :  { %2816 = vmatprep.subr.bf16.mxu0 %v3885_v25 }
 0x290   :  { %2858 = vmatpush1.bf16.msra.mxu1 %v3740_v32  ;;  %v1146_v32 = vld [vmem:[#allocation11 + $0x20] sm:$0xff] }
 0x291   :  { %2860 = vmatprep.subr.bf16.mxu1 %v3743_v34  ;;  %v3887_v34 = vpack.c.bf16 %v1146_v32, %v1142_v26 }
 0x293   :  { %2818 = vmatpush1.bf16.msra.mxu0 %v3887_v34 }
 0x294   :  { %2862 = vmatpush1.bf16.msra.mxu1 %v3750_v39  ;;  %v1151_v39 = vld [vmem:[#allocation11 + $0x48] sm:$0xff] }
 0x295   :  { %2864 = vmatprep.subr.bf16.mxu1 %v3753_v40  ;;  %v1155_v40 = vld [vmem:[#allocation11 + $0x68] sm:$0xff] }
 0x298   :  { %2866 = vmatpush1.bf16.msra.mxu1 %v3760_v47  ;;  %v3891_v47 = vpack.c.bf16 %v1155_v40, %v1151_v39 }
 0x299   :  { %2868 = vmatprep.subr.bf16.mxu1 %v3763_v48  ;;  %v1150_v48 = vld [vmem:[#allocation11 + $0x40] sm:$0xff] }
 0x29a   :  { %2820 = vmatprep.subr.bf16.mxu0 %v3891_v47 }
 0x29c   :  { %2870 = vmatpush1.bf16.msra.mxu1 %v3766_v55  ;;  %v1154_v55 = vld [vmem:[#allocation11 + $0x60] sm:$0xff] }
 0x29d   :  { %2872 = vmatprep.subr.bf16.mxu1 %v3769_v56  ;;  %v3893_v56 = vpack.c.bf16 %v1154_v55, %v1150_v48 }
 0x29f   :  { %2822 = vmatpush1.bf16.msra.mxu0 %v3893_v56 }
 0x2a0   :  { %2874 = vmatpush1.bf16.msra.mxu1 %v3772_v62  ;;  %v1159_v62 = vld [vmem:[#allocation11 + $0x88] sm:$0xff] }
 0x2a1   :  { %2876 = vmatprep.subr.bf16.mxu1 %v3775_v63  ;;  %v1163_v63 = vld [vmem:[#allocation11 + $0xa8] sm:$0xff] }
 0x2a4   :  { %2878 = vmatpush1.bf16.msra.mxu1 %v3778_v5  ;;  %v3897_v5 = vpack.c.bf16 %v1163_v63, %v1159_v62 }
 0x2a6   :  { %2824 = vmatprep.subr.bf16.mxu0 %v3897_v5 }
 0x2a7   :  { %2826 = vmatpush1.bf16.msra.mxu0 %v3899_v54 }
 0x2a8   :  { %2828 = vmatprep.subr.bf16.mxu0 %v3903_v60 }
 0x2ab   :  { %2830 = vmatpush1.bf16.msra.mxu0 %v3905_v4 }
 0x2ac   :  { %2832 = vmatprep.subr.bf16.mxu0 %v3909_v10 }
 0x2af   :  { %2834 = vmatpush1.bf16.msra.mxu0 %v3911_v14 }
 0x2b0   :  { %2836 = vmatprep.subr.bf16.mxu0 %v3915_v16 }
 0x2b3   :  { %2838 = vmatpush1.bf16.msra.mxu0 %v3917_v24 }
 0x2b4   :  { %2840 = vmatprep.subr.bf16.mxu0 %v3920_v44 }
 0x2b7   :  { %2842 = vmatpush1.bf16.msra.mxu0 %v3923_v58 }
 0x2b8   :  { %2844 = vmatprep.subr.bf16.mxu0 %v3926_v1 }
 0x2bb   :  { %2846 = vmatpush1.bf16.msra.mxu0 %v3929_v9 }
 0x2bc   :  { %2880 = vmatprep.subr.bf16.mxu0 %v3885_v25 }
 0x35a   :  { %v1033_v28 = vpop.f32.mrb[4].mxu0  ;;  %v1104_v29 = vpop.f32.mrb[4].mxu1 }
 0x35b   :  { %v3173_v31 = vadd.f32 %v1033_v28, %v3804_v20  ;;  %v1035_v35 = vpop.f32.mrb[5].mxu0  ;;  %v1106_v36 = vpop.f32.mrb[5].mxu1  ;;  %v3189_v15 = vadd.f32 %v1104_v29, %v3810_v46  ;;  %v1399_v28 = vld [vmem:[#allocation11 + $0x90] sm:$0xff] }
 0x35c   :  { %v3174_v37 = vadd.f32 %v1035_v35, %v3806_v21  ;;  %v3190_v18 = vadd.f32 %v1106_v36, %v3812_v52  ;;  %v1403_v29 = vld [vmem:[#allocation11 + $0xb0] sm:$0xff]  ;;  %v1408_v35 = vld [vmem:[#allocation11 + $0xd8] sm:$0xff] }
 0x35d   :  { %v2524_v41 = vmul.f32 -1.442695, %v3173_v31  ;;  %v2526_v26 = vmul.f32 -1.442695, %v3189_v15  ;;  %v3978_v31 = vpack.c.bf16 %v1403_v29, %v1399_v28  ;;  %v1412_v36 = vld [vmem:[#allocation11 + $0xf8] sm:$0xff] }
 0x35e   :  { %v2525_v42 = vmul.f32 -1.442695, %v3174_v37  ;;  %v3982_v37 = vpack.c.bf16 %v1412_v36, %v1408_v35 }
 0x35f   :  { %3274 = vpow2.f32 %v2524_v41  ;;  %v1407_v41 = vld [vmem:[#allocation11 + $0xd0] sm:$0xff] }
 0x360   :  { %3276 = vpow2.f32 %v2525_v42  ;;  %v1411_v42 = vld [vmem:[#allocation11 + $0xf0] sm:$0xff] }
 0x361   :  { %3278 = vtanh.f32 %v3190_v18  ;;  %v3984_v15 = vpack.c.bf16 %v1411_v42, %v1407_v41  ;;  %v1416_v18 = vld [vmem:[#allocation11 + $0x118] sm:$0xff] }
 0x362   :  { %3280 = vpow2.f32 %v2526_v26  ;;  %v1420_v26 = vld [vmem:[#allocation11 + $0x138] sm:$0xff] }
 0x369   :  { %v3275_v32 = vpop.eup %3274 }
 0x36a   :  { %v1122_v39 = vadd.f32 1.0, %v3275_v32  ;;  %v3277_v40 = vpop.eup %3276  ;;  %v3988_v32 = vpack.c.bf16 %v1420_v26, %v1416_v18 }
 0x36b   :  { %v1123_v48 = vadd.f32 1.0, %v3277_v40  ;;  %v3279_v55 = vpop.eup %3278  ;;  %v1419_v40 = vld [vmem:[#allocation11 + $0x130] sm:$0xff] }
 0x36c   :  { %3282 = vrcp.f32 %v1122_v39  ;;  %v3281_v62 = vpop.eup %3280  ;;  %v1415_v39 = vld [vmem:[#allocation11 + $0x110] sm:$0xff] }
 0x36d   :  { %3284 = vrcp.f32 %v1123_v48  ;;  %v1124_v12 = vadd.f32 1.0, %v3281_v62  ;;  %v3990_v48 = vpack.c.bf16 %v1419_v40, %v1415_v39  ;;  %v1428_v62 = vld [vmem:[#allocation11 + $0x178] sm:$0xff] }
 0x36f   :  { %3286 = vrcp.f32 %v1124_v12 }
 0x376   :  { %v3283_v63 = vpop.eup %3282 }
 0x377   :  { %v1133_v49 = vmul.f32 %v3283_v63, %v3279_v55  ;;  %v3285_v53 = vpop.eup %3284  ;;  %v1424_v55 = vld [vmem:[#allocation11 + $0x158] sm:$0xff] }
 0x378   :  { %v1132_v59 = vmul.f32 %v3285_v53, %v3861_v38  ;;  %v1384_v38 = vld [vmem:[#allocation11 + $0x18] sm:$0xff]  ;;  %v3994_v63 = vpack.c.bf16 %v1428_v62, %v1424_v55  ;;  %v1427_v53 = vld [vmem:[#allocation11 + $0x170] sm:$0xff] }
 0x379   :  { %v3287_v3 = vpop.eup %3286  ;;  %v3964_v13 = vpack.c.bf16 %v1388_v11, %v1384_v38  ;;  %v1435_v11 = vld [vmem:[#allocation11 + $0x1b0] sm:$0xff] }
 0x37a   :  { %v3939_v61 = vadd.f32 %v1133_v49, %v1132_v59  ;;  %v1423_v49 = vld [vmem:[#allocation11 + $0x150] sm:$0xff]  ;;  %v1432_v59 = vld [vmem:[#allocation11 + $0x198] sm:$0xff] }
 0x37b   :  { %2912 = vmatprep.subr.bf16.mxu1 %v3964_v13  ;;  %v3996_v12 = vpack.c.bf16 %v1427_v53, %v1423_v49 }
 0x37c   :  { %3288 = vtanh.f32 %v3939_v61 }
 0x386   :  { %v3289_v6 = vpop.eup %3288 }
 0x387   :  { %v3942_v7 = vmul.f32 %v3289_v6, %v3287_v3  ;;  %v1436_v3 = vld [vmem:[#allocation11 + $0x1b8] sm:$0xff]  ;;  %v1431_v6 = vld [vmem:[#allocation11 + $0x190] sm:$0xff] }
 0x388   :  { %v3999_v38 = vpack.c.bf16 %v1436_v3, %v1432_v59  ;;  %v4002_v23 = vpack.c.bf16 %v1435_v11, %v1431_v6 }
 0x389   :  { %1271 = vmatmul.mubr.f32.vlgmr.msra.gmra.mrb[6].mxu0 %v3942_v7  ;;  %1342 = vmatmul.mubr.f32.vlgmr.msra.gmra.mrb[6].mxu1 %v3942_v7 }
 0x38a   :  { %2882 = vmatpush1.bf16.msra.mxu0 %v3887_v34  ;;  %1509 = vmatprep.mubr.f32.mxu0 %v3496_v0 }
 0x38b   :  { %2884 = vmatprep.subr.bf16.mxu0 %v3891_v47  ;;  %1580 = vmatprep.mubr.f32.mxu1 %v3496_v0 }
 0x38c   :  { %2914 = vmatpush1.bf16.msra.mxu1 %v3966_v17 }
 0x38d   :  { %2916 = vmatprep.subr.bf16.mxu1 %v3970_v33 }
 0x38e   :  { %2886 = vmatpush1.bf16.msra.mxu0 %v3893_v56 }
 0x38f   :  { %2888 = vmatprep.subr.bf16.mxu0 %v3897_v5 }
 0x390   :  { %2918 = vmatpush1.bf16.msra.mxu1 %v3972_v51 }
 0x391   :  { %2920 = vmatprep.subr.bf16.mxu1 %v3976_v8 }
 0x392   :  { %2890 = vmatpush1.bf16.msra.mxu0 %v3899_v54 }
 0x393   :  { %2892 = vmatprep.subr.bf16.mxu0 %v3903_v60 }
 0x394   :  { %2922 = vmatpush1.bf16.msra.mxu1 %v3978_v31 }
 0x395   :  { %2924 = vmatprep.subr.bf16.mxu1 %v3982_v37 }
 0x396   :  { %2894 = vmatpush1.bf16.msra.mxu0 %v3905_v4 }
 0x397   :  { %2896 = vmatprep.subr.bf16.mxu0 %v3909_v10 }
 0x398   :  { %2926 = vmatpush1.bf16.msra.mxu1 %v3984_v15 }
 0x399   :  { %2928 = vmatprep.subr.bf16.mxu1 %v3988_v32 }
 0x39a   :  { %2898 = vmatpush1.bf16.msra.mxu0 %v3911_v14 }
 0x39b   :  { %2900 = vmatprep.subr.bf16.mxu0 %v3915_v16 }
 0x39c   :  { %2930 = vmatpush1.bf16.msra.mxu1 %v3990_v48 }
 0x39d   :  { %2932 = vmatprep.subr.bf16.mxu1 %v3994_v63 }
 0x39e   :  { %2902 = vmatpush1.bf16.msra.mxu0 %v3917_v24 }
 0x39f   :  { %2904 = vmatprep.subr.bf16.mxu0 %v3920_v44 }
 0x3a0   :  { %2934 = vmatpush1.bf16.msra.mxu1 %v3996_v12 }
 0x3a1   :  { %2936 = vmatprep.subr.bf16.mxu1 %v3999_v38 }
 0x3a2   :  { %2906 = vmatpush1.bf16.msra.mxu0 %v3923_v58 }
 0x3a3   :  { %2908 = vmatprep.subr.bf16.mxu0 %v3926_v1 }
 0x3a4   :  { %2938 = vmatpush1.bf16.msra.mxu1 %v4002_v23 }
 0x3a5   :  { %2940 = vmatprep.subr.bf16.mxu1 %v4005_v30 }
 0x3a6   :  { %2910 = vmatpush1.bf16.msra.mxu0 %v3929_v9 }
 0x3a7   :  { %2944 = vmatprep.subr.bf16.mxu0 %v3885_v25 }
 0x3a8   :  { %2942 = vmatpush1.bf16.msra.mxu1 %v4008_v57 }
 0x3a9   :  { %2976 = vmatprep.subr.bf16.mxu1 %v3964_v13 }
 0x45c   :  { %v1272_v2 = vpop.f32.mrb[6].mxu0  ;;  %v1343_v28 = vpop.f32.mrb[6].mxu1 }
 0x45d   :  { %v3175_v29 = vadd.f32 %v1272_v2, %v3804_v20  ;;  %v1274_v35 = vpop.f32.mrb[7].mxu0  ;;  %v1345_v36 = vpop.f32.mrb[7].mxu1  ;;  %v3191_v26 = vadd.f32 %v1343_v28, %v3810_v46 }
 0x45e   :  { %v3176_v41 = vadd.f32 %v1274_v35, %v3806_v21  ;;  %v3192_v39 = vadd.f32 %v1345_v36, %v3812_v52 }
 0x45f   :  { %v2527_v42 = vmul.f32 -1.442695, %v3175_v29  ;;  %v2529_v40 = vmul.f32 -1.442695, %v3191_v26 }
 0x460   :  { %v2528_v18 = vmul.f32 -1.442695, %v3176_v41 }
 0x461   :  { %3290 = vpow2.f32 %v2527_v42 }
 0x462   :  { %3292 = vpow2.f32 %v2528_v18 }
 0x463   :  { %3294 = vtanh.f32 %v3192_v39 }
 0x464   :  { %3296 = vpow2.f32 %v2529_v40 }
 0x46b   :  { %v3291_v55 = vpop.eup %3290 }
 0x46c   :  { %v1361_v62 = vadd.f32 1.0, %v3291_v55  ;;  %v3293_v49 = vpop.eup %3292 }
 0x46d   :  { %v1362_v53 = vadd.f32 1.0, %v3293_v49  ;;  %v3295_v59 = vpop.eup %3294 }
 0x46e   :  { %3298 = vrcp.f32 %v1361_v62  ;;  %v3297_v3 = vpop.eup %3296 }
 0x46f   :  { %3300 = vrcp.f32 %v1362_v53  ;;  %v1363_v22 = vadd.f32 1.0, %v3297_v3 }
 0x471   :  { %3302 = vrcp.f32 %v1363_v22 }
 0x478   :  { %v3299_v6 = vpop.eup %3298 }
 0x479   :  { %v1372_v11 = vmul.f32 %v3299_v6, %v3295_v59  ;;  %v3301_v19 = vpop.eup %3300 }
 0x47a   :  { %v1371_v43 = vmul.f32 %v3301_v19, %v3939_v61 }
 0x47b   :  { %v3303_v2 = vpop.eup %3302 }
 0x47c   :  { %v4018_v50 = vadd.f32 %v1372_v11, %v1371_v43 }
 0x47e   :  { %3304 = vtanh.f32 %v4018_v50 }
 0x488   :  { %v3305_v28 = vpop.eup %3304 }
 0x489   :  { %v4021_v29 = vmul.f32 %v3305_v28, %v3303_v2 }
 0x48b   :  { %1510 = vmatmul.mubr.f32.vlgmr.msra.gmra.mrb[8].mxu0 %v4021_v29  ;;  %1581 = vmatmul.mubr.f32.vlgmr.msra.gmra.mrb[8].mxu1 %v4021_v29 }
 0x48c   :  { %2946 = vmatpush1.bf16.msra.mxu0 %v3887_v34  ;;  %2978 = vmatpush1.bf16.msra.mxu1 %v3966_v17 }
 0x48d   :  { %2948 = vmatprep.subr.bf16.mxu0 %v3891_v47  ;;  %2980 = vmatprep.subr.bf16.mxu1 %v3970_v33 }
 0x48e   :  { %1748 = vmatprep.mubr.f32.mxu0 %v3496_v0  ;;  %1819 = vmatprep.mubr.f32.mxu1 %v3496_v0 }
 0x490   :  { %2950 = vmatpush1.bf16.msra.mxu0 %v3893_v56  ;;  %2982 = vmatpush1.bf16.msra.mxu1 %v3972_v51 }
 0x491   :  { %2952 = vmatprep.subr.bf16.mxu0 %v3897_v5  ;;  %2984 = vmatprep.subr.bf16.mxu1 %v3976_v8 }
 0x494   :  { %2954 = vmatpush1.bf16.msra.mxu0 %v3899_v54  ;;  %2986 = vmatpush1.bf16.msra.mxu1 %v3978_v31 }
 0x495   :  { %2956 = vmatprep.subr.bf16.mxu0 %v3903_v60  ;;  %2988 = vmatprep.subr.bf16.mxu1 %v3982_v37 }
 0x498   :  { %2958 = vmatpush1.bf16.msra.mxu0 %v3905_v4  ;;  %2990 = vmatpush1.bf16.msra.mxu1 %v3984_v15 }
 0x499   :  { %2960 = vmatprep.subr.bf16.mxu0 %v3909_v10  ;;  %2992 = vmatprep.subr.bf16.mxu1 %v3988_v32 }
 0x49c   :  { %2962 = vmatpush1.bf16.msra.mxu0 %v3911_v14  ;;  %2994 = vmatpush1.bf16.msra.mxu1 %v3990_v48 }
 0x49d   :  { %2964 = vmatprep.subr.bf16.mxu0 %v3915_v16  ;;  %2996 = vmatprep.subr.bf16.mxu1 %v3994_v63 }
 0x4a0   :  { %2966 = vmatpush1.bf16.msra.mxu0 %v3917_v24  ;;  %2998 = vmatpush1.bf16.msra.mxu1 %v3996_v12 }
 0x4a1   :  { %2968 = vmatprep.subr.bf16.mxu0 %v3920_v44  ;;  %3000 = vmatprep.subr.bf16.mxu1 %v3999_v38 }
 0x4a4   :  { %2970 = vmatpush1.bf16.msra.mxu0 %v3923_v58  ;;  %3002 = vmatpush1.bf16.msra.mxu1 %v4002_v23 }
 0x4a5   :  { %2972 = vmatprep.subr.bf16.mxu0 %v3926_v1  ;;  %3004 = vmatprep.subr.bf16.mxu1 %v4005_v30 }
 0x4a8   :  { %2974 = vmatpush1.bf16.msra.mxu0 %v3929_v9  ;;  %3006 = vmatpush1.bf16.msra.mxu1 %v4008_v57 }
 0x4a9   :  { %3008 = vmatprep.subr.bf16.mxu0 %v3885_v25  ;;  %3040 = vmatprep.subr.bf16.mxu1 %v3964_v13 }
 0x55e   :  { %v1511_v61 = vpop.f32.mrb[8].mxu0  ;;  %v1582_v35 = vpop.f32.mrb[8].mxu1 }
 0x55f   :  { %v3177_v36 = vadd.f32 %v1511_v61, %v3804_v20  ;;  %v1513_v41 = vpop.f32.mrb[9].mxu0  ;;  %v1584_v42 = vpop.f32.mrb[9].mxu1  ;;  %v3193_v40 = vadd.f32 %v1582_v35, %v3810_v46 }
 0x560   :  { %v3178_v18 = vadd.f32 %v1513_v41, %v3806_v21  ;;  %v3194_v55 = vadd.f32 %v1584_v42, %v3812_v52 }
 0x561   :  { %v2530_v26 = vmul.f32 -1.442695, %v3177_v36  ;;  %v2532_v62 = vmul.f32 -1.442695, %v3193_v40 }
 0x562   :  { %v2531_v39 = vmul.f32 -1.442695, %v3178_v18 }
 0x563   :  { %3306 = vpow2.f32 %v2530_v26 }
 0x564   :  { %3308 = vpow2.f32 %v2531_v39 }
 0x565   :  { %3310 = vtanh.f32 %v3194_v55 }
 0x566   :  { %3312 = vpow2.f32 %v2532_v62 }
 0x56d   :  { %v3307_v25 = vpop.eup %3306 }
 0x56e   :  { %v1600_v49 = vadd.f32 1.0, %v3307_v25  ;;  %v3309_v53 = vpop.eup %3308 }
 0x56f   :  { %v1601_v59 = vadd.f32 1.0, %v3309_v53  ;;  %v3311_v3 = vpop.eup %3310 }
 0x570   :  { %3314 = vrcp.f32 %v1600_v49  ;;  %v3313_v6 = vpop.eup %3312  ;;  %v2118_v49 = vld [vmem:[#allocation11 + $0xa0] sm:$0xff] }
 0x571   :  { %3316 = vrcp.f32 %v1601_v59  ;;  %v1602_v43 = vadd.f32 1.0, %v3313_v6  ;;  %v2123_v59 = vld [vmem:[#allocation11 + $0xc8] sm:$0xff] }
 0x573   :  { %3318 = vrcp.f32 %v1602_v43  ;;  %v2131_v43 = vld [vmem:[#allocation11 + $0x108] sm:$0xff] }
 0x57a   :  { %v3315_v11 = vpop.eup %3314 }
 0x57b   :  { %v1611_v19 = vmul.f32 %v3315_v11, %v3311_v3  ;;  %v3317_v22 = vpop.eup %3316  ;;  %v2127_v3 = vld [vmem:[#allocation11 + $0xe8] sm:$0xff]  ;;  %v2122_v11 = vld [vmem:[#allocation11 + $0xc0] sm:$0xff] }
 0x57c   :  { %v1610_v2 = vmul.f32 %v3317_v22, %v4018_v50  ;;  %v3083_v6 = vpack.c.bf16 %v2127_v3, %v2123_v59 }
 0x57d   :  { %v3319_v61 = vpop.eup %3318 }
 0x57e   :  { %v4064_v28 = vadd.f32 %v1611_v19, %v1610_v2  ;;  %v2126_v19 = vld [vmem:[#allocation11 + $0xe0] sm:$0xff]  ;;  %v2135_v2 = vld [vmem:[#allocation11 + $0x128] sm:$0xff] }
 0x57f   :  { %v3085_v22 = vpack.c.bf16 %v2126_v19, %v2122_v11  ;;  %v2345_v11 = vld [vmem:[#allocation12 + $0x10] sm:$0xff]  ;;  %v2346_v19 = vld [vmem:[#allocation12 + $0x18] sm:$0xff] }
 0x580   :  { %3320 = vtanh.f32 %v4064_v28 }
 0x58a   :  { %v3321_v35 = vpop.eup %3320 }
 0x58b   :  { %v4067_v36 = vmul.f32 %v3321_v35, %v3319_v61  ;;  %v2130_v61 = vld [vmem:[#allocation11 + $0x100] sm:$0xff] }
 0x58c   :  { %v2134_v35 = vld [vmem:[#allocation11 + $0x120] sm:$0xff] }
 0x58d   :  { %1749 = vmatmul.mubr.f32.vlgmr.msra.gmra.mrb[10].mxu0 %v4067_v36  ;;  %1820 = vmatmul.mubr.f32.vlgmr.msra.gmra.mrb[10].mxu1 %v4067_v36 }
 0x58e   :  { %3010 = vmatpush1.bf16.msra.mxu0 %v3887_v34  ;;  %3042 = vmatpush1.bf16.msra.mxu1 %v3966_v17 }
 0x58f   :  { %3012 = vmatprep.subr.bf16.mxu0 %v3891_v47  ;;  %3044 = vmatprep.subr.bf16.mxu1 %v3970_v33 }
 0x590   :  { %1987 = vmatprep.mubr.f32.mxu0 %v3496_v0  ;;  %2058 = vmatprep.mubr.f32.mxu1 %v3496_v0 }
 0x592   :  { %3014 = vmatpush1.bf16.msra.mxu0 %v3893_v56  ;;  %3046 = vmatpush1.bf16.msra.mxu1 %v3972_v51 }
 0x593   :  { %3016 = vmatprep.subr.bf16.mxu0 %v3897_v5  ;;  %3048 = vmatprep.subr.bf16.mxu1 %v3976_v8 }
 0x596   :  { %3018 = vmatpush1.bf16.msra.mxu0 %v3899_v54  ;;  %3050 = vmatpush1.bf16.msra.mxu1 %v3978_v31 }
 0x597   :  { %3020 = vmatprep.subr.bf16.mxu0 %v3903_v60  ;;  %3052 = vmatprep.subr.bf16.mxu1 %v3982_v37 }
 0x59a   :  { %3022 = vmatpush1.bf16.msra.mxu0 %v3905_v4  ;;  %3054 = vmatpush1.bf16.msra.mxu1 %v3984_v15 }
 0x59b   :  { %3024 = vmatprep.subr.bf16.mxu0 %v3909_v10  ;;  %3056 = vmatprep.subr.bf16.mxu1 %v3988_v32 }
 0x59e   :  { %3026 = vmatpush1.bf16.msra.mxu0 %v3911_v14  ;;  %3058 = vmatpush1.bf16.msra.mxu1 %v3990_v48 }
 0x59f   :  { %3028 = vmatprep.subr.bf16.mxu0 %v3915_v16  ;;  %3060 = vmatprep.subr.bf16.mxu1 %v3994_v63 }
 0x5a2   :  { %3030 = vmatpush1.bf16.msra.mxu0 %v3917_v24  ;;  %3062 = vmatpush1.bf16.msra.mxu1 %v3996_v12 }
 0x5a3   :  { %3032 = vmatprep.subr.bf16.mxu0 %v3920_v44  ;;  %3064 = vmatprep.subr.bf16.mxu1 %v3999_v38 }
 0x5a6   :  { %3034 = vmatpush1.bf16.msra.mxu0 %v3923_v58  ;;  %3066 = vmatpush1.bf16.msra.mxu1 %v4002_v23 }
 0x5a7   :  { %3036 = vmatprep.subr.bf16.mxu0 %v3926_v1  ;;  %3068 = vmatprep.subr.bf16.mxu1 %v4005_v30 }
 0x5aa   :  { %3038 = vmatpush1.bf16.msra.mxu0 %v3929_v9  ;;  %3070 = vmatpush1.bf16.msra.mxu1 %v4008_v57 }
 0x5ab   :  { %3104 = vmatprep.subr.bf16.mxu1 %v3964_v13 }
 0x660   :  { %v1750_v34 = vpop.f32.mrb[10].mxu0  ;;  %v1821_v47 = vpop.f32.mrb[10].mxu1 }
 0x661   :  { %v3179_v56 = vadd.f32 %v1750_v34, %v3804_v20  ;;  %v1752_v5 = vpop.f32.mrb[11].mxu0  ;;  %v1823_v54 = vpop.f32.mrb[11].mxu1  ;;  %v3195_v14 = vadd.f32 %v1821_v47, %v3810_v46  ;;  %v3089_v34 = vpack.c.bf16 %v2134_v35, %v2130_v61  ;;  %v2139_v47 = vld [vmem:[#allocation11 + $0x148] sm:$0xff]  ;;  %v2347_v61 = vld [vmem:[#allocation12 + $0x20] sm:$0xff] }
 0x662   :  { %v3180_v60 = vadd.f32 %v1752_v5, %v3806_v21  ;;  %v3196_v16 = vadd.f32 %v1823_v54, %v3812_v52  ;;  %v2138_v54 = vld [vmem:[#allocation11 + $0x140] sm:$0xff]  ;;  %v2348_v35 = vld [vmem:[#allocation12 + $0x28] sm:$0xff] }
 0x663   :  { %v2533_v4 = vmul.f32 -1.442695, %v3179_v56  ;;  %v2535_v24 = vmul.f32 -1.442695, %v3195_v14  ;;  %v2143_v56 = vld [vmem:[#allocation11 + $0x168] sm:$0xff] }
 0x664   :  { %v2534_v10 = vmul.f32 -1.442695, %v3180_v60  ;;  %v3091_v5 = vpack.c.bf16 %v2143_v56, %v2139_v47  ;;  %v2142_v60 = vld [vmem:[#allocation11 + $0x160] sm:$0xff]  ;;  %v2151_v14 = vld [vmem:[#allocation11 + $0x1a8] sm:$0xff]  ;;  %v2350_v47 = vld [vmem:[#allocation12 + $0x38] sm:$0xff] }
 0x665   :  { %3322 = vpow2.f32 %v2533_v4  ;;  %v3093_v4 = vpack.c.bf16 %v2142_v60, %v2138_v54  ;;  %v2352_v54 = vld [vmem:[#allocation12 + $0x48] sm:$0xff] }
 0x666   :  { %3324 = vpow2.f32 %v2534_v10  ;;  %v2147_v10 = vld [vmem:[#allocation11 + $0x188] sm:$0xff] }
 0x667   :  { %3326 = vtanh.f32 %v3196_v16  ;;  %v2146_v16 = vld [vmem:[#allocation11 + $0x180] sm:$0xff] }
 0x668   :  { %3328 = vpow2.f32 %v2535_v24  ;;  %v3095_v24 = vpack.c.bf16 %v2151_v14, %v2147_v10  ;;  %v2354_v10 = vld [vmem:[#allocation12 + $0x58] sm:$0xff] }
 0x66f   :  { %v3323_v44 = vpop.eup %3322 }
 0x670   :  { %v1839_v58 = vadd.f32 1.0, %v3323_v44  ;;  %v3325_v1 = vpop.eup %3324  ;;  %v2150_v44 = vld [vmem:[#allocation11 + $0x1a0] sm:$0xff] }
 0x671   :  { %v1840_v9 = vadd.f32 1.0, %v3325_v1  ;;  %v3327_v13 = vpop.eup %3326  ;;  %v2159_v1 = vld [vmem:[#allocation11 + $0x1e8] sm:$0xff] }
 0x672   :  { %3330 = vrcp.f32 %v1839_v58  ;;  %v3329_v50 = vpop.eup %3328  ;;  %v2155_v58 = vld [vmem:[#allocation11 + $0x1c8] sm:$0xff] }
 0x673   :  { %3332 = vrcp.f32 %v1840_v9  ;;  %v1841_v26 = vadd.f32 1.0, %v3329_v50  ;;  %v3097_v9 = vpack.c.bf16 %v2150_v44, %v2146_v16  ;;  %v2154_v50 = vld [vmem:[#allocation11 + $0x1c0] sm:$0xff]  ;;  %v2357_v44 = vld [vmem:[#allocation12 + $0x70] sm:$0xff] }
 0x674   :  { %v2355_v16 = vld [vmem:[#allocation12 + $0x60] sm:$0xff] }
 0x675   :  { %3334 = vrcp.f32 %v1841_v26 }
 0x67c   :  { %v3331_v41 = vpop.eup %3330 }
 0x67d   :  { %v1850_v42 = vmul.f32 %v3331_v41, %v3327_v13  ;;  %v3333_v18 = vpop.eup %3332  ;;  %v3099_v13 = vpack.c.bf16 %v2159_v1, %v2155_v58  ;;  %v2158_v41 = vld [vmem:[#allocation11 + $0x1e0] sm:$0xff]  ;;  %v2358_v58 = vld [vmem:[#allocation12 + $0x78] sm:$0xff] }
 0x67e   :  { %v1849_v39 = vmul.f32 %v3333_v18, %v4064_v28  ;;  %v3087_v28 = vpack.c.bf16 %v2135_v2, %v2131_v43  ;;  %v2344_v18 = vld [vmem:[#allocation12 + $0x8] sm:$0xff]  ;;  %v3101_v26 = vpack.c.bf16 %v2158_v41, %v2154_v50  ;;  %v3163_v1 = vpack.c.bf16 %v2358_v58, %v2357_v44 }
 0x67f   :  { %v3335_v55 = vpop.eup %3334 }
 0x680   :  { %v4109_v40 = vadd.f32 %v1850_v42, %v1849_v39  ;;  %v2343_v42 = vld [vmem:[#allocation12] sm:$0xff] }
 0x681   :  { %v3135_v39 = vpack.c.bf16 %v2344_v18, %v2343_v42 }
 0x682   :  { %3336 = vtanh.f32 %v4109_v40 }
 0x68c   :  { %v3337_v62 = vpop.eup %3336 }
 0x68d   :  { %v4112_v25 = vmul.f32 %v3337_v62, %v3335_v55 }
 0x68f   :  { %1988 = vmatmul.mubr.f32.vlgmr.msra.gmra.mrb[12].mxu0 %v4112_v25  ;;  %2059 = vmatmul.mubr.f32.vlgmr.msra.gmra.mrb[12].mxu1 %v4112_v25 }
 0x690   :  { %3106 = vmatpush1.bf16.msra.mxu1 %v3966_v17  ;;  %2226 = vmatprep.mubr.f32.mxu0 %v3496_v0  ;;  %v2103_v17 = vld [vmem:[#allocation11 + $0x28] sm:$0xff] }
 0x691   :  { %3108 = vmatprep.subr.bf16.mxu1 %v3970_v33  ;;  %2297 = vmatprep.mubr.f32.mxu1 %v3496_v0  ;;  %v2099_v0 = vld [vmem:[#allocation11 + $0x8] sm:$0xff] }
 0x692   :  { %v3071_v33 = vpack.c.bf16 %v2103_v17, %v2099_v0 }
 0x694   :  { %3110 = vmatpush1.bf16.msra.mxu1 %v3972_v51  ;;  %v2098_v51 = vld [vmem:[#allocation11] sm:$0xff]  ;;  %3072 = vmatprep.subr.bf16.mxu0 %v3071_v33 }
 0x695   :  { %3112 = vmatprep.subr.bf16.mxu1 %v3976_v8  ;;  %v2102_v8 = vld [vmem:[#allocation11 + $0x20] sm:$0xff] }
 0x698   :  { %3114 = vmatpush1.bf16.msra.mxu1 %v3978_v31  ;;  %v3073_v31 = vpack.c.bf16 %v2102_v8, %v2098_v51 }
 0x699   :  { %3116 = vmatprep.subr.bf16.mxu1 %v3982_v37  ;;  %v2107_v37 = vld [vmem:[#allocation11 + $0x48] sm:$0xff] }
 0x69a   :  { %3074 = vmatpush1.bf16.msra.mxu0 %v3073_v31 }
 0x69c   :  { %3118 = vmatpush1.bf16.msra.mxu1 %v3984_v15  ;;  %v2111_v15 = vld [vmem:[#allocation11 + $0x68] sm:$0xff] }
 0x69d   :  { %3120 = vmatprep.subr.bf16.mxu1 %v3988_v32  ;;  %v3075_v32 = vpack.c.bf16 %v2111_v15, %v2107_v37 }
 0x69f   :  { %3076 = vmatprep.subr.bf16.mxu0 %v3075_v32 }
 0x6a0   :  { %3122 = vmatpush1.bf16.msra.mxu1 %v3990_v48  ;;  %v2106_v48 = vld [vmem:[#allocation11 + $0x40] sm:$0xff] }
 0x6a1   :  { %3124 = vmatprep.subr.bf16.mxu1 %v3994_v63  ;;  %v2110_v63 = vld [vmem:[#allocation11 + $0x60] sm:$0xff] }
 0x6a4   :  { %3126 = vmatpush1.bf16.msra.mxu1 %v3996_v12  ;;  %v3077_v12 = vpack.c.bf16 %v2110_v63, %v2106_v48 }
 0x6a5   :  { %3128 = vmatprep.subr.bf16.mxu1 %v3999_v38  ;;  %v2115_v38 = vld [vmem:[#allocation11 + $0x88] sm:$0xff] }
 0x6a6   :  { %3078 = vmatpush1.bf16.msra.mxu0 %v3077_v12 }
 0x6a8   :  { %3130 = vmatpush1.bf16.msra.mxu1 %v4002_v23  ;;  %v2119_v23 = vld [vmem:[#allocation11 + $0xa8] sm:$0xff] }
 0x6a9   :  { %3132 = vmatprep.subr.bf16.mxu1 %v4005_v30  ;;  %v3079_v30 = vpack.c.bf16 %v2119_v23, %v2115_v38 }
 0x6ab   :  { %3080 = vmatprep.subr.bf16.mxu0 %v3079_v30 }
 0x6ac   :  { %3134 = vmatpush1.bf16.msra.mxu1 %v4008_v57  ;;  %v2114_v57 = vld [vmem:[#allocation11 + $0x80] sm:$0xff] }
 0x6ad   :  { %v3081_v53 = vpack.c.bf16 %v2118_v49, %v2114_v57 }
 0x6af   :  { %3082 = vmatpush1.bf16.msra.mxu0 %v3081_v53 }
 0x6b0   :  { %3084 = vmatprep.subr.bf16.mxu0 %v3083_v6 }
 0x6b3   :  { %3086 = vmatpush1.bf16.msra.mxu0 %v3085_v22 }
 0x6b4   :  { %3088 = vmatprep.subr.bf16.mxu0 %v3087_v28  ;;  %v3139_v28 = vpack.c.bf16 %v2346_v19, %v2345_v11 }
 0x6b7   :  { %3090 = vmatpush1.bf16.msra.mxu0 %v3089_v34  ;;  %v2349_v34 = vld [vmem:[#allocation12 + $0x30] sm:$0xff] }
 0x6b8   :  { %3092 = vmatprep.subr.bf16.mxu0 %v3091_v5  ;;  %v3147_v56 = vpack.c.bf16 %v2350_v47, %v2349_v34  ;;  %v2351_v5 = vld [vmem:[#allocation12 + $0x40] sm:$0xff] }
 0x6b9   :  { %v3151_v60 = vpack.c.bf16 %v2352_v54, %v2351_v5 }
 0x6bb   :  { %3094 = vmatpush1.bf16.msra.mxu0 %v3093_v4  ;;  %v2353_v4 = vld [vmem:[#allocation12 + $0x50] sm:$0xff] }
 0x6bc   :  { %3096 = vmatprep.subr.bf16.mxu0 %v3095_v24  ;;  %v3155_v14 = vpack.c.bf16 %v2354_v10, %v2353_v4  ;;  %v2356_v24 = vld [vmem:[#allocation12 + $0x68] sm:$0xff] }
 0x6bf   :  { %3098 = vmatpush1.bf16.msra.mxu0 %v3097_v9 }
 0x6c0   :  { %3100 = vmatprep.subr.bf16.mxu0 %v3099_v13 }
 0x6c3   :  { %3102 = vmatpush1.bf16.msra.mxu0 %v3101_v26 }
 0x6c4   :  { %3136 = vmatprep.subr.bf16.mxu0 %v3135_v39 }
 0x762   :  { %v1989_v55 = vpop.f32.mrb[12].mxu0  ;;  %v2060_v62 = vpop.f32.mrb[12].mxu1 }
 0x763   :  { %v3181_v0 = vadd.f32 %v1989_v55, %v3804_v20  ;;  %v1991_v17 = vpop.f32.mrb[13].mxu0  ;;  %v2062_v33 = vpop.f32.mrb[13].mxu1  ;;  %v3197_v37 = vadd.f32 %v2060_v62, %v3810_v46 }
 0x764   :  { %v3182_v51 = vadd.f32 %v1991_v17, %v3806_v21  ;;  %v3198_v15 = vadd.f32 %v2062_v33, %v3812_v52 }
 0x765   :  { %v2536_v8 = vmul.f32 -1.442695, %v3181_v0  ;;  %v2538_v32 = vmul.f32 -1.442695, %v3197_v37 }
 0x766   :  { %v2537_v31 = vmul.f32 -1.442695, %v3182_v51 }
 0x767   :  { %3338 = vpow2.f32 %v2536_v8 }
 0x768   :  { %3340 = vpow2.f32 %v2537_v31 }
 0x769   :  { %3342 = vtanh.f32 %v3198_v15 }
 0x76a   :  { %3344 = vpow2.f32 %v2538_v32 }
 0x771   :  { %v3339_v48 = vpop.eup %3338 }
 0x772   :  { %v2078_v63 = vadd.f32 1.0, %v3339_v48  ;;  %v3341_v12 = vpop.eup %3340 }
 0x773   :  { %v2079_v38 = vadd.f32 1.0, %v3341_v12  ;;  %v3343_v23 = vpop.eup %3342 }
 0x774   :  { %3346 = vrcp.f32 %v2078_v63  ;;  %v3345_v30 = vpop.eup %3344 }
 0x775   :  { %3348 = vrcp.f32 %v2079_v38  ;;  %v2080_v59 = vadd.f32 1.0, %v3345_v30 }
 0x777   :  { %3350 = vrcp.f32 %v2080_v59 }
 0x77e   :  { %v3347_v57 = vpop.eup %3346 }
 0x77f   :  { %v2089_v49 = vmul.f32 %v3347_v57, %v3343_v23  ;;  %v3349_v53 = vpop.eup %3348 }
 0x780   :  { %v2088_v3 = vmul.f32 %v3349_v53, %v4109_v40  ;;  %v3143_v40 = vpack.c.bf16 %v2348_v35, %v2347_v61 }
 0x781   :  { %v3351_v22 = vpop.eup %3350 }
 0x782   :  { %v4138_v6 = vadd.f32 %v2089_v49, %v2088_v3 }
 0x784   :  { %3352 = vtanh.f32 %v4138_v6 }
 0x78e   :  { %v3353_v43 = vpop.eup %3352 }
 0x78f   :  { %v2092_v2 = vmul.f32 %v3353_v43, %v3351_v22 }
 0x791   :  { %2227 = vmatmul.mubr.f32.vlgmr.msra.gmra.mrb[14].mxu0 %v2092_v2  ;;  %2298 = vmatmul.mubr.f32.vlgmr.msra.gmra.mrb[14].mxu1 %v2092_v2 }
 0x792   :  { %3138 = vmatpush3.bf16.msra.mxu0 %v3135_v39  ;;  %2599 = vmatprep.mubr.f32.mxu0 %v3819_v27  ;;  %v3159_v27 = vpack.c.bf16 %v2356_v24, %v2355_v16 }
 0x793   :  { %3140 = vmatprep.subr.bf16.mxu0 %v3139_v28 }
 0x796   :  { %3142 = vmatpush3.bf16.msra.mxu0 %v3139_v28 }
 0x797   :  { %3144 = vmatprep.subr.bf16.mxu0 %v3143_v40 }
 0x79a   :  { %3146 = vmatpush3.bf16.msra.mxu0 %v3143_v40 }
 0x79b   :  { %3148 = vmatprep.subr.bf16.mxu0 %v3147_v56 }
 0x79e   :  { %3150 = vmatpush3.bf16.msra.mxu0 %v3147_v56 }
 0x79f   :  { %3152 = vmatprep.subr.bf16.mxu0 %v3151_v60 }
 0x7a2   :  { %3154 = vmatpush3.bf16.msra.mxu0 %v3151_v60 }
 0x7a3   :  { %3156 = vmatprep.subr.bf16.mxu0 %v3155_v14 }
 0x7a6   :  { %3158 = vmatpush3.bf16.msra.mxu0 %v3155_v14 }
 0x7a7   :  { %3160 = vmatprep.subr.bf16.mxu0 %v3159_v27 }
 0x7aa   :  { %3162 = vmatpush3.bf16.msra.mxu0 %v3159_v27 }
 0x7ab   :  { %3164 = vmatprep.subr.bf16.mxu0 %v3163_v1 }
 0x7ae   :  { %3166 = vmatpush3.bf16.msra.mxu0 %v3163_v1 }
 0x7b1   :  { %2600 = vmatmul.mubr.f32.vlgmr.msra.gmra.mrb[16].mxu0 %v3864_v45 }
 0x7b2   :  { %2602 = vmatprep.mubr.f32.mxu0 %v3942_v7 }
 0x7b5   :  { %2603 = vmatmul.mubr.f32.gmra.mrb[18].mxu0 %v4021_v29 }
 0x7b6   :  { %2605 = vmatprep.mubr.f32.mxu0 %v4067_v36 }
 0x7b9   :  { %2606 = vmatmul.mubr.f32.gmra.mrb[20].mxu0 %v4112_v25 }
 0x7ba   :  { %2608 = vmatprep.mubr.f32.mxu0 %v2092_v2 }
 0x864   :  { %v2228_v9 = vpop.f32.mrb[14].mxu0  ;;  %v2299_v13 = vpop.f32.mrb[14].mxu1 }
 0x865   :  { %v3183_v50 = vadd.f32 %v2228_v9, %v3804_v20  ;;  %v2230_v41 = vpop.f32.mrb[15].mxu0  ;;  %v2301_v42 = vpop.f32.mrb[15].mxu1  ;;  %v3199_v45 = vadd.f32 %v2299_v13, %v3810_v46  ;;  %v2542_v46 = vld [vmem:[%s4175_s5] ss:$0 sm:$0xff]  ;;  %s3498_s5 = smov [#allocation14]  }
 0x866   :  { %v3184_v18 = vadd.f32 %v2230_v41, %v3806_v21  ;;  %v3200_v7 = vadd.f32 %v2301_v42, %v3812_v52  ;;  %s2484_s25 = sshll.u32 %s3498_s5, 4  ;;  %s2485_s25 = int_to_ptr.vmem [resolvable:$true] %s2484_s25 }
 0x867   :  { %v2539_v26 = vmul.f32 -1.442695, %v3183_v50  ;;  %v2541_v29 = vmul.f32 -1.442695, %v3199_v45  ;;  %s3458_s26 = scalar_lea.vmem %s2485_s25, 1024  ;;  %p3463_p5 = scmp.lt.s32.totalorder %s2485_s25, %s2485_s25 }
 0x868   :  { %v2540_v39 = vmul.f32 -1.442695, %v3184_v18  ;;  %p3459_p4 = scmp.ne.s32.totalorder %s2485_s25, %s3458_s26  ;;  %p3464_p6 = scmp.lt.s32.totalorder %s3458_s26, %s3458_s26 }
 0x869   :  { %3354 = vpow2.f32 %v2539_v26 }
 0x86a   :  { %3356 = vpow2.f32 %v2540_v39  ;;  %p3465_p7 = por %p3464_p6, %p3463_p5 }
 0x86b   :  { %3358 = vtanh.f32 %v3200_v7 }
 0x86c   :  { %3360 = vpow2.f32 %v2541_v29  ;;  %p3466_p8 = pnand %p3465_p7, %p3459_p4 }
 0x873   :  { %v3355_v36 = vpop.eup %3354 }
 0x874   :  { %v2317_v25 = vadd.f32 1.0, %v3355_v36  ;;  %v3357_v55 = vpop.eup %3356 }
 0x875   :  { %v2318_v20 = vadd.f32 1.0, %v3357_v55  ;;  %v3359_v62 = vpop.eup %3358 }
 0x876   :  { %3362 = vrcp.f32 %v2317_v25  ;;  %v3361_v0 = vpop.eup %3360 }
 0x877   :  { %3364 = vrcp.f32 %v2318_v20  ;;  %v2319_v51 = vadd.f32 1.0, %v3361_v0 }
 0x879   :  { %3366 = vrcp.f32 %v2319_v51 }
 0x880   :  { %v3363_v21 = vpop.eup %3362 }
 0x881   :  { %v2328_v17 = vmul.f32 %v3363_v21, %v3359_v62  ;;  %v3365_v33 = vpop.eup %3364 }
 0x882   :  { %v2327_v52 = vmul.f32 %v3365_v33, %v4138_v6 }
 0x883   :  { %v3367_v53 = vpop.eup %3366 }
 0x884   :  { %v2601_v8 = vpop.f32.mrb[16].mxu0  ;;  %v2329_v31 = vadd.f32 %v2328_v17, %v2327_v52 }
 0x885   :  { %v2438_v37 = vadd.f32 %v2601_v8, %v2542_v46  ;;  %v2432_v15 = vpop.f32.mrb[17].mxu0 }
 0x886   :  { %v2433_v32 = vadd.f32 %v2542_v46, %v2432_v15  ;;  %3368 = vtanh.f32 %v2329_v31 }
 0x887   :  { %2472 = vst [vmem:[#allocation14 + $0x8] sm:$0xff] %v2438_v37 }
 0x888   :  { %2471 = vst [vmem:[#allocation14] sm:$0xff] %v2433_v32  ;;  %v2604_v48 = vpop.f32.mrb[18].mxu0 }
 0x889   :  { %v2448_v63 = vadd.f32 %v2604_v48, %v2542_v46  ;;  %v2442_v12 = vpop.f32.mrb[19].mxu0 }
 0x88a   :  { %v2443_v38 = vadd.f32 %v2542_v46, %v2442_v12 }
 0x88b   :  { %2474 = vst [vmem:[#allocation14 + $0x18] sm:$0xff] %v2448_v63 }
 0x88c   :  { %2473 = vst [vmem:[#allocation14 + $0x10] sm:$0xff] %v2443_v38  ;;  %v2607_v23 = vpop.f32.mrb[20].mxu0 }
 0x88d   :  { %v2458_v30 = vadd.f32 %v2607_v23, %v2542_v46  ;;  %v2452_v57 = vpop.f32.mrb[21].mxu0 }
 0x88e   :  { %v2453_v49 = vadd.f32 %v2542_v46, %v2452_v57 }
 0x88f   :  { %2476 = vst [vmem:[#allocation14 + $0x28] sm:$0xff] %v2458_v30 }
 0x890   :  { %2475 = vst [vmem:[#allocation14 + $0x20] sm:$0xff] %v2453_v49  ;;  %v3369_v59 = vpop.eup %3368 }
 0x891   :  { %v2331_v3 = vmul.f32 %v3369_v59, %v3367_v53 }
 0x893   :  { %2609 = vmatmul.mubr.f32.gmra.mrb[22].mxu0 %v2331_v3 }
 0x966   :  { %v2610_v6 = vpop.f32.mrb[22].mxu0 }
 0x967   :  { %v2468_v11 = vadd.f32 %v2610_v6, %v2542_v46  ;;  %v2462_v19 = vpop.f32.mrb[23].mxu0 }
 0x968   :  { %v2463_v22 = vadd.f32 %v2542_v46, %v2462_v19 }
 0x969   :  { %2478 = vst [vmem:[#allocation14 + $0x38] sm:$0xff] %v2468_v11 }
 0x96a   :  { %2477 = vst [vmem:[#allocation14 + $0x30] sm:$0xff] %v2463_v22 }
 0x96b   :  { %3469 = shalt.err (!%p3466_p8)
}
 0x96c   :  { %s3470_s29 = scalar_lea.hbm %s4176_s6, 1024 }
 0x96d   :  { %p3471_p9 = scmp.ne.s32.totalorder %s4176_s6, %s3470_s29  ;;  %p3474_p10 = scmp.lt.u32.totalorder %s3470_s29, %s4176_s6 }
 0x96f   :  { %p3476_p11 = pnand %p3474_p10, %p3471_p9 }
 0x971   :  { %3479 = shalt.err (!%p3476_p11)
}
 0x972   :  { %2490 = dma.vmem_to_hbm [thread:$0]  %s2485_s25, 1024, %s4176_s6, [#allocation8], %s3492_s1, %s3492_s1, %s3493_s21  }
 0x973   :  { %3486 = dma.done.wait [#allocation8], 1024  }
 0x974   :  { %3487 = vsyncadd [#allocation8], 4294966272 }
 0x975   :  { %2494 = vsyncpa [#allocation7], 1 }
 0x976   :  { %2495 = vsyncpa [#allocation10], 1 }
 0x977   :  { %2496 = vsyncpa [#allocation13], 1 }
 0x978   :  { %2497 = vsyncpa [#allocation8], 1 }

</bundles_post_ra>
